<compile_context>
chip_gen: v7x
topology: tpu7x:2x2x1
jax: 0.10.0
libtpu: 0.0.40
codegen_flags: <defaults>
</compile_context>

<pallas_src>
import functools

import jax
import jax.numpy as jnp
from jax.experimental import pallas as pl
from jax.experimental.pallas import tpu as pltpu

NEG_SLOPE = 0.01          # torch.nn.functional.leaky_relu default
N_LAYERS = 10             # lin_1 + 4 res blocks * 2 + lin_last
LANE = 128
COMPUTE_DTYPE = jnp.bfloat16


def _leaky_relu(v):
    # max(v, a*v) == leaky_relu(v) for 0 <= a <= 1  (mul+max, no cmp+select)
    return jnp.maximum(v, NEG_SLOPE * v)


def resforward_kernel(phi_ref, act_ref, wx_ref, wa_ref, out_ref, p_scratch, *, fp):
    # One lane-dense MXU pass covering all 10 per-layer action projections AND
    # all 10 biases (the ones column of `act` multiplies the bias row of wa):
    #   p_scratch[:, l*Fp:(l+1)*Fp] == act @ W_a[l] + b[l]
    # Stored in explicit VMEM scratch so the (TM, 10*Fp) f32 block never has to
    # stay live in vregs across the whole 10-layer chain.
    p_scratch[...] = jnp.dot(act_ref[...], wa_ref[...],
                             preferred_element_type=jnp.float32)

    def linear(layer, xin):
        wx = wx_ref[layer]                               # (Fp, Fp) static index
        return (jnp.dot(xin.astype(wx.dtype), wx,        # bf16 operands
                        preferred_element_type=jnp.float32)  # f32 accumulation
                + p_scratch[:, layer * fp:(layer + 1) * fp])

    x = _leaky_relu(linear(0, phi_ref[...]))             # lin_1
    for rb in range(4):                                  # res_block_1..4
        res = _leaky_relu(linear(1 + 2 * rb, x))
        res = linear(2 + 2 * rb, res)
        x = res + x
    x = linear(9, x)                                     # lin_last
    out_ref[...] = x.astype(out_ref.dtype)


def _round_up(v, m):
    return ((v + m - 1) // m) * m


def _pick_tiling(m):
    """Row tile TM (multiple of 8, <= 512) and padded rows Mp = steps * TM,
    with at least 2 grid steps so v7x's second TensorCore gets work."""
    n_steps = max(2, pl.cdiv(m, 512))
    tm = _round_up(pl.cdiv(m, n_steps), 8)
    return tm, tm * n_steps


def _vmem_cap_bytes():
    """~56 MiB on v7x (64 MiB physical per TC), ~96 MiB on v4/v5/v6 (128 MiB)."""
    try:
        kind = jax.devices()[0].device_kind.lower()
    except Exception:
        kind = ""
    if any(tag in kind for tag in ("v4", "v5", "v6")):
        return 96 * 2**20
    return 56 * 2**20


def _build_call(*, TM, Mp, Fp, HA1, out_dtype, vmem_limit, cost,
                single_buffer_weights):
    wkw = {}
    if single_buffer_weights:
        # Grid-invariant weights: single-buffer them to halve their VMEM
        # footprint (matters most on v7x's 64 MiB VMEM).
        wkw = dict(pipeline_mode=pl.Buffered(1))
    return pl.pallas_call(
        functools.partial(resforward_kernel, fp=Fp),
        out_shape=jax.ShapeDtypeStruct((Mp, Fp), out_dtype),
        grid_spec=pltpu.PrefetchScalarGridSpec(
            num_scalar_prefetch=0,
            grid=(Mp // TM,),
            in_specs=[
                pl.BlockSpec((TM, Fp), lambda i: (i, 0)),              # phi (padded)
                pl.BlockSpec((TM, HA1), lambda i: (i, 0)),             # [action | 1 | 0pad]
                pl.BlockSpec((N_LAYERS, Fp, Fp), lambda i: (0, 0, 0), **wkw),   # W_x
                pl.BlockSpec((HA1, N_LAYERS * Fp), lambda i: (0, 0), **wkw),    # W_a+bias
            ],
            out_specs=pl.BlockSpec((TM, Fp), lambda i: (i, 0)),
            scratch_shapes=[pltpu.VMEM((TM, N_LAYERS * Fp), jnp.float32)],
        ),
        compiler_params=pltpu.CompilerParams(
            dimension_semantics=("parallel",),
            vmem_limit_bytes=vmem_limit),
        cost_estimate=cost,
    )


def res_forward(phi1, action, weights, biases):
    """phi1: (B,T,F), action: (B,T,HA), weights: (10, F+HA, F), biases: (10, F)."""
    B, T, F = phi1.shape
    HA = action.shape[-1]
    M = B * T
    Fp = _round_up(F, LANE)                  # lane-dense feature width
    pad_f = Fp - F
    TM, Mp = _pick_tiling(M)
    HA1 = _round_up(HA + 1, 16)              # action + ones column, sublane-padded

    # --- activations: flatten, append ones column, pad rows/cols, cast bf16 ---
    phi_flat = phi1.reshape(M, F)
    act_flat = action.reshape(M, HA)
    act_aug = jnp.concatenate(
        [act_flat, jnp.ones((M, 1), act_flat.dtype)], axis=1)           # (M, HA+1)
    phi_p = jnp.pad(phi_flat, ((0, Mp - M), (0, pad_f))).astype(COMPUTE_DTYPE)
    act_p = jnp.pad(act_aug, ((0, Mp - M), (0, HA1 - (HA + 1)))).astype(COMPUTE_DTYPE)

    # --- weights: split + pad on host; bias folded in as an extra W_a row ---
    wx = weights[:, :F, :]                                              # (10, F, F)
    wa = weights[:, F:, :]                                              # (10, HA, F)
    b = biases                                                          # (10, F)
    if pad_f:
        wx = jnp.pad(wx, ((0, 0), (0, pad_f), (0, pad_f)))
        wa = jnp.pad(wa, ((0, 0), (0, 0), (0, pad_f)))
        b = jnp.pad(b, ((0, 0), (0, pad_f)))
    wx = wx.astype(COMPUTE_DTYPE)                                       # (10, Fp, Fp)
    wa_b = jnp.concatenate([wa, b[:, None, :]], axis=1)                 # (10, HA+1, Fp)
    wa_b = jnp.pad(wa_b, ((0, 0), (0, HA1 - (HA + 1)), (0, 0)))         # (10, HA1, Fp)
    wa_all = (jnp.transpose(wa_b, (1, 0, 2))
              .reshape(HA1, N_LAYERS * Fp).astype(COMPUTE_DTYPE))       # (HA1, 10*Fp)

    # --- VMEM budget: double-buffered activation/out tiles, worst-case 2x
    #     weights (fallback path), f32 p_all scratch, + headroom; per-gen cap.
    out_itemsize = jnp.dtype(phi1.dtype).itemsize
    act_tiles = 2 * (phi_p.dtype.itemsize * TM * Fp
                     + act_p.dtype.itemsize * TM * HA1
                     + out_itemsize * TM * Fp)
    weight_bytes = 2 * (wx.nbytes + wa_all.nbytes)
    scratch_bytes = TM * N_LAYERS * Fp * 4
    need = act_tiles + weight_bytes + scratch_bytes + (8 << 20)
    vmem_limit = int(min(_vmem_cap_bytes(), max(32 * 2**20, need)))

    # Advisory cost with the padded dims actually executed.
    cost = pl.CostEstimate(
        flops=2 * Mp * Fp * Fp * N_LAYERS + 2 * Mp * HA1 * N_LAYERS * Fp,
        transcendentals=0,
        bytes_accessed=int(phi_p.nbytes + act_p.nbytes + wx.nbytes
                           + wa_all.nbytes + Mp * Fp * out_itemsize),
    )

    def run(single_buffer_weights):
        fn = _build_call(TM=TM, Mp=Mp, Fp=Fp, HA1=HA1, out_dtype=phi1.dtype,
                         vmem_limit=vmem_limit, cost=cost,
                         single_buffer_weights=single_buffer_weights)
        return jax.block_until_ready(fn(phi_p, act_p, wx, wa_all))

    if hasattr(pl, "Buffered"):
        try:
            out_flat = run(True)
        except Exception:
            # pipeline_mode=Buffered(1) not supported -> default double-buffering.
            out_flat = run(False)
    else:
        out_flat = run(False)

    return out_flat[:M, :F].reshape(B, T, F)


def res_forward_ref(phi1, action, weights, biases):
    """Pure-JAX f32 reference of the PyTorch forward (original stacked layout)."""
    def linear(layer, xin, act):
        cat = jnp.concatenate([xin, act], axis=2)
        return cat @ weights[layer] + biases[layer]

    x = jax.nn.leaky_relu(linear(0, phi1, action), NEG_SLOPE)
    for rb in range(4):
        res = jax.nn.leaky_relu(linear(1 + 2 * rb, x, action), NEG_SLOPE)
        res = linear(2 + 2 * rb, res, action)
        x = res + x
    return linear(9, x, action)


def init_params(key, feature_size, action_size, horizon):
    """Mimics torch.nn.Linear default init (uniform +-1/sqrt(fan_in)), math layout."""
    HA = horizon * action_size
    in_dim = feature_size + HA
    bound = 1.0 / jnp.sqrt(jnp.float32(in_dim))
    kw, kb = jax.random.split(key)
    weights = jax.random.uniform(
        kw, (N_LAYERS, in_dim, feature_size), jnp.float32, -bound, bound)
    biases = jax.random.uniform(
        kb, (N_LAYERS, feature_size), jnp.float32, -bound, bound)
    return weights, biases


if __name__ == "__main__":
    B, T = 2, 8
    feature_size, action_size, horizon = 32, 4, 2
    HA = horizon * action_size

    key = jax.random.PRNGKey(0)
    k_phi, k_act, k_par = jax.random.split(key, 3)
    phi1 = jax.random.normal(k_phi, (B, T, feature_size), jnp.float32)
    action = jax.random.normal(k_act, (B, T, HA), jnp.float32)
    weights, biases = init_params(k_par, feature_size, action_size, horizon)

    out = res_forward(phi1, action, weights, biases)
    out = jax.block_until_ready(out)

    ref = res_forward_ref(phi1, action, weights, biases)
    assert out.shape == (B, T, feature_size)
    # bf16 operands (intentional precision tradeoff) vs f32 reference:
    # loosened tolerance covers ~10 layers of bf16 rounding with f32 accumulation.
    assert jnp.allclose(out, ref, atol=1e-1, rtol=5e-2), "mismatch vs JAX reference"

    print("KERNEL_OK")
</pallas_src>

<mosaic_0001>
module attributes {stable_mosaic.version = 11 : i64} {
  func.func @resforward_kernel(%arg0: i32, %arg1: memref<8x128xbf16, #tpu.memory_space<vmem>>, %arg2: memref<8x16xbf16, #tpu.memory_space<vmem>>, %arg3: memref<10x128x128xbf16, #tpu.memory_space<vmem>>, %arg4: memref<16x1280xbf16, #tpu.memory_space<vmem>>, %arg5: memref<8x128xf32, #tpu.memory_space<vmem>>, %arg6: memref<8x1280xf32, #tpu.memory_space<vmem>>) attributes {dimension_semantics = [#tpu.dimension_semantics<parallel>], iteration_bounds = array<i64: 2>, scalar_prefetch = 0 : i64, scratch_operands = 1 : i64, tpu.core_type = #tpu.core_type<tc>, window_params = [{transform_indices = @transform_0, window_bounds = array<i64: 8, 128>}, {transform_indices = @transform_1, window_bounds = array<i64: 8, 16>}, {pipeline_mode = #tpu.pipeline_mode<synchronous>, transform_indices = @transform_2, window_bounds = array<i64: 10, 128, 128>}, {pipeline_mode = #tpu.pipeline_mode<synchronous>, transform_indices = @transform_3, window_bounds = array<i64: 16, 1280>}, {transform_indices = @transform_4, window_bounds = array<i64: 8, 128>}]} {
    %c0 = arith.constant 0 : index
    %c0_0 = arith.constant 0 : index
    %0 = vector.load %arg2[%c0, %c0_0] : memref<8x16xbf16, #tpu.memory_space<vmem>>, vector<8x16xbf16>
    %c0_1 = arith.constant 0 : index
    %c0_2 = arith.constant 0 : index
    %1 = vector.load %arg4[%c0_1, %c0_2] : memref<16x1280xbf16, #tpu.memory_space<vmem>>, vector<16x1280xbf16>
    %cst = arith.constant dense<0.000000e+00> : vector<8x1280xf32>
    %2 = tpu.matmul %0, %1, %cst {dimension_numbers = #tpu.dot_dimension_numbers<[1], [0], [0], [1], [0, 0, 1, 1], [], []>} : vector<8x16xbf16>, vector<16x1280xbf16>, vector<8x1280xf32> -> vector<8x1280xf32>
    %c0_3 = arith.constant 0 : index
    %c0_4 = arith.constant 0 : index
    %3 = vector.load %arg6[%c0_3, %c0_4] : memref<8x1280xf32, #tpu.memory_space<vmem>>, vector<8x1280xf32>
    tpu.vector_store %arg6[%c0_3, %c0_4], %2 {strides = array<i32>} : memref<8x1280xf32, #tpu.memory_space<vmem>>, vector<8x1280xf32>,
    %c0_5 = arith.constant 0 : index
    %c0_6 = arith.constant 0 : index
    %4 = vector.load %arg1[%c0_5, %c0_6] : memref<8x128xbf16, #tpu.memory_space<vmem>>, vector<8x128xbf16>
    %c0_7 = arith.constant 0 : index
    %c0_8 = arith.constant 0 : index
    %c0_9 = arith.constant 0 : index
    %5 = vector.load %arg3[%c0_7, %c0_8, %c0_9] : memref<10x128x128xbf16, #tpu.memory_space<vmem>>, vector<1x128x128xbf16>
    %6 = vector.shape_cast %5 : vector<1x128x128xbf16> to vector<128x128xbf16>
    %cst_10 = arith.constant dense<0.000000e+00> : vector<8x128xf32>
    %7 = tpu.matmul %4, %6, %cst_10 {dimension_numbers = #tpu.dot_dimension_numbers<[1], [0], [0], [1], [0, 0, 1, 1], [], []>} : vector<8x128xbf16>, vector<128x128xbf16>, vector<8x128xf32> -> vector<8x128xf32>
    %c0_11 = arith.constant 0 : index
    %c0_12 = arith.constant 0 : index
    %8 = vector.load %arg6[%c0_11, %c0_12] : memref<8x1280xf32, #tpu.memory_space<vmem>>, vector<8x128xf32>
    %9 = arith.addf %7, %8 : vector<8x128xf32>
    %cst_13 = arith.constant 0.00999999977 : f32
    %10 = vector.broadcast %cst_13 : f32 to vector<8x128xf32>
    %11 = arith.mulf %10, %9 : vector<8x128xf32>
    %12 = arith.maximumf %9, %11 : vector<8x128xf32>
    %c1 = arith.constant 1 : index
    %c0_14 = arith.constant 0 : index
    %c0_15 = arith.constant 0 : index
    %13 = vector.load %arg3[%c1, %c0_14, %c0_15] : memref<10x128x128xbf16, #tpu.memory_space<vmem>>, vector<1x128x128xbf16>
    %14 = vector.shape_cast %13 : vector<1x128x128xbf16> to vector<128x128xbf16>
    %15 = arith.truncf %12 : vector<8x128xf32> to vector<8x128xbf16>
    %cst_16 = arith.constant dense<0.000000e+00> : vector<8x128xf32>
    %16 = tpu.matmul %15, %14, %cst_16 {dimension_numbers = #tpu.dot_dimension_numbers<[1], [0], [0], [1], [0, 0, 1, 1], [], []>} : vector<8x128xbf16>, vector<128x128xbf16>, vector<8x128xf32> -> vector<8x128xf32>
    %c0_17 = arith.constant 0 : index
    %c128 = arith.constant 128 : index
    %17 = vector.load %arg6[%c0_17, %c128] : memref<8x1280xf32, #tpu.memory_space<vmem>>, vector<8x128xf32>
    %18 = arith.addf %16, %17 : vector<8x128xf32>
    %cst_18 = arith.constant 0.00999999977 : f32
    %19 = vector.broadcast %cst_18 : f32 to vector<8x128xf32>
    %20 = arith.mulf %19, %18 : vector<8x128xf32>
    %21 = arith.maximumf %18, %20 : vector<8x128xf32>
    %c2 = arith.constant 2 : index
    %c0_19 = arith.constant 0 : index
    %c0_20 = arith.constant 0 : index
    %22 = vector.load %arg3[%c2, %c0_19, %c0_20] : memref<10x128x128xbf16, #tpu.memory_space<vmem>>, vector<1x128x128xbf16>
    %23 = vector.shape_cast %22 : vector<1x128x128xbf16> to vector<128x128xbf16>
    %24 = arith.truncf %21 : vector<8x128xf32> to vector<8x128xbf16>
    %cst_21 = arith.constant dense<0.000000e+00> : vector<8x128xf32>
    %25 = tpu.matmul %24, %23, %cst_21 {dimension_numbers = #tpu.dot_dimension_numbers<[1], [0], [0], [1], [0, 0, 1, 1], [], []>} : vector<8x128xbf16>, vector<128x128xbf16>, vector<8x128xf32> -> vector<8x128xf32>
    %c0_22 = arith.constant 0 : index
    %c256 = arith.constant 256 : index
    %26 = vector.load %arg6[%c0_22, %c256] : memref<8x1280xf32, #tpu.memory_space<vmem>>, vector<8x128xf32>
    %27 = arith.addf %25, %26 : vector<8x128xf32>
    %28 = arith.addf %27, %12 : vector<8x128xf32>
    %c3 = arith.constant 3 : index
    %c0_23 = arith.constant 0 : index
    %c0_24 = arith.constant 0 : index
    %29 = vector.load %arg3[%c3, %c0_23, %c0_24] : memref<10x128x128xbf16, #tpu.memory_space<vmem>>, vector<1x128x128xbf16>
    %30 = vector.shape_cast %29 : vector<1x128x128xbf16> to vector<128x128xbf16>
    %31 = arith.truncf %28 : vector<8x128xf32> to vector<8x128xbf16>
    %cst_25 = arith.constant dense<0.000000e+00> : vector<8x128xf32>
    %32 = tpu.matmul %31, %30, %cst_25 {dimension_numbers = #tpu.dot_dimension_numbers<[1], [0], [0], [1], [0, 0, 1, 1], [], []>} : vector<8x128xbf16>, vector<128x128xbf16>, vector<8x128xf32> -> vector<8x128xf32>
    %c0_26 = arith.constant 0 : index
    %c384 = arith.constant 384 : index
    %33 = vector.load %arg6[%c0_26, %c384] : memref<8x1280xf32, #tpu.memory_space<vmem>>, vector<8x128xf32>
    %34 = arith.addf %32, %33 : vector<8x128xf32>
    %cst_27 = arith.constant 0.00999999977 : f32
    %35 = vector.broadcast %cst_27 : f32 to vector<8x128xf32>
    %36 = arith.mulf %35, %34 : vector<8x128xf32>
    %37 = arith.maximumf %34, %36 : vector<8x128xf32>
    %c4 = arith.constant 4 : index
    %c0_28 = arith.constant 0 : index
    %c0_29 = arith.constant 0 : index
    %38 = vector.load %arg3[%c4, %c0_28, %c0_29] : memref<10x128x128xbf16, #tpu.memory_space<vmem>>, vector<1x128x128xbf16>
    %39 = vector.shape_cast %38 : vector<1x128x128xbf16> to vector<128x128xbf16>
    %40 = arith.truncf %37 : vector<8x128xf32> to vector<8x128xbf16>
    %cst_30 = arith.constant dense<0.000000e+00> : vector<8x128xf32>
    %41 = tpu.matmul %40, %39, %cst_30 {dimension_numbers = #tpu.dot_dimension_numbers<[1], [0], [0], [1], [0, 0, 1, 1], [], []>} : vector<8x128xbf16>, vector<128x128xbf16>, vector<8x128xf32> -> vector<8x128xf32>
    %c0_31 = arith.constant 0 : index
    %c512 = arith.constant 512 : index
    %42 = vector.load %arg6[%c0_31, %c512] : memref<8x1280xf32, #tpu.memory_space<vmem>>, vector<8x128xf32>
    %43 = arith.addf %41, %42 : vector<8x128xf32>
    %44 = arith.addf %43, %28 : vector<8x128xf32>
    %c5 = arith.constant 5 : index
    %c0_32 = arith.constant 0 : index
    %c0_33 = arith.constant 0 : index
    %45 = vector.load %arg3[%c5, %c0_32, %c0_33] : memref<10x128x128xbf16, #tpu.memory_space<vmem>>, vector<1x128x128xbf16>
    %46 = vector.shape_cast %45 : vector<1x128x128xbf16> to vector<128x128xbf16>
    %47 = arith.truncf %44 : vector<8x128xf32> to vector<8x128xbf16>
    %cst_34 = arith.constant dense<0.000000e+00> : vector<8x128xf32>
    %48 = tpu.matmul %47, %46, %cst_34 {dimension_numbers = #tpu.dot_dimension_numbers<[1], [0], [0], [1], [0, 0, 1, 1], [], []>} : vector<8x128xbf16>, vector<128x128xbf16>, vector<8x128xf32> -> vector<8x128xf32>
    %c0_35 = arith.constant 0 : index
    %c640 = arith.constant 640 : index
    %49 = vector.load %arg6[%c0_35, %c640] : memref<8x1280xf32, #tpu.memory_space<vmem>>, vector<8x128xf32>
    %50 = arith.addf %48, %49 : vector<8x128xf32>
    %cst_36 = arith.constant 0.00999999977 : f32
    %51 = vector.broadcast %cst_36 : f32 to vector<8x128xf32>
    %52 = arith.mulf %51, %50 : vector<8x128xf32>
    %53 = arith.maximumf %50, %52 : vector<8x128xf32>
    %c6 = arith.constant 6 : index
    %c0_37 = arith.constant 0 : index
    %c0_38 = arith.constant 0 : index
    %54 = vector.load %arg3[%c6, %c0_37, %c0_38] : memref<10x128x128xbf16, #tpu.memory_space<vmem>>, vector<1x128x128xbf16>
    %55 = vector.shape_cast %54 : vector<1x128x128xbf16> to vector<128x128xbf16>
    %56 = arith.truncf %53 : vector<8x128xf32> to vector<8x128xbf16>
    %cst_39 = arith.constant dense<0.000000e+00> : vector<8x128xf32>
    %57 = tpu.matmul %56, %55, %cst_39 {dimension_numbers = #tpu.dot_dimension_numbers<[1], [0], [0], [1], [0, 0, 1, 1], [], []>} : vector<8x128xbf16>, vector<128x128xbf16>, vector<8x128xf32> -> vector<8x128xf32>
    %c0_40 = arith.constant 0 : index
    %c768 = arith.constant 768 : index
    %58 = vector.load %arg6[%c0_40, %c768] : memref<8x1280xf32, #tpu.memory_space<vmem>>, vector<8x128xf32>
    %59 = arith.addf %57, %58 : vector<8x128xf32>
    %60 = arith.addf %59, %44 : vector<8x128xf32>
    %c7 = arith.constant 7 : index
    %c0_41 = arith.constant 0 : index
    %c0_42 = arith.constant 0 : index
    %61 = vector.load %arg3[%c7, %c0_41, %c0_42] : memref<10x128x128xbf16, #tpu.memory_space<vmem>>, vector<1x128x128xbf16>
    %62 = vector.shape_cast %61 : vector<1x128x128xbf16> to vector<128x128xbf16>
    %63 = arith.truncf %60 : vector<8x128xf32> to vector<8x128xbf16>
    %cst_43 = arith.constant dense<0.000000e+00> : vector<8x128xf32>
    %64 = tpu.matmul %63, %62, %cst_43 {dimension_numbers = #tpu.dot_dimension_numbers<[1], [0], [0], [1], [0, 0, 1, 1], [], []>} : vector<8x128xbf16>, vector<128x128xbf16>, vector<8x128xf32> -> vector<8x128xf32>
    %c0_44 = arith.constant 0 : index
    %c896 = arith.constant 896 : index
    %65 = vector.load %arg6[%c0_44, %c896] : memref<8x1280xf32, #tpu.memory_space<vmem>>, vector<8x128xf32>
    %66 = arith.addf %64, %65 : vector<8x128xf32>
    %cst_45 = arith.constant 0.00999999977 : f32
    %67 = vector.broadcast %cst_45 : f32 to vector<8x128xf32>
    %68 = arith.mulf %67, %66 : vector<8x128xf32>
    %69 = arith.maximumf %66, %68 : vector<8x128xf32>
    %c8 = arith.constant 8 : index
    %c0_46 = arith.constant 0 : index
    %c0_47 = arith.constant 0 : index
    %70 = vector.load %arg3[%c8, %c0_46, %c0_47] : memref<10x128x128xbf16, #tpu.memory_space<vmem>>, vector<1x128x128xbf16>
    %71 = vector.shape_cast %70 : vector<1x128x128xbf16> to vector<128x128xbf16>
    %72 = arith.truncf %69 : vector<8x128xf32> to vector<8x128xbf16>
    %cst_48 = arith.constant dense<0.000000e+00> : vector<8x128xf32>
    %73 = tpu.matmul %72, %71, %cst_48 {dimension_numbers = #tpu.dot_dimension_numbers<[1], [0], [0], [1], [0, 0, 1, 1], [], []>} : vector<8x128xbf16>, vector<128x128xbf16>, vector<8x128xf32> -> vector<8x128xf32>
    %c0_49 = arith.constant 0 : index
    %c1024 = arith.constant 1024 : index
    %74 = vector.load %arg6[%c0_49, %c1024] : memref<8x1280xf32, #tpu.memory_space<vmem>>, vector<8x128xf32>
    %75 = arith.addf %73, %74 : vector<8x128xf32>
    %76 = arith.addf %75, %60 : vector<8x128xf32>
    %c9 = arith.constant 9 : index
    %c0_50 = arith.constant 0 : index
    %c0_51 = arith.constant 0 : index
    %77 = vector.load %arg3[%c9, %c0_50, %c0_51] : memref<10x128x128xbf16, #tpu.memory_space<vmem>>, vector<1x128x128xbf16>
    %78 = vector.shape_cast %77 : vector<1x128x128xbf16> to vector<128x128xbf16>
    %79 = arith.truncf %76 : vector<8x128xf32> to vector<8x128xbf16>
    %cst_52 = arith.constant dense<0.000000e+00> : vector<8x128xf32>
    %80 = tpu.matmul %79, %78, %cst_52 {dimension_numbers = #tpu.dot_dimension_numbers<[1], [0], [0], [1], [0, 0, 1, 1], [], []>} : vector<8x128xbf16>, vector<128x128xbf16>, vector<8x128xf32> -> vector<8x128xf32>
    %c0_53 = arith.constant 0 : index
    %c1152 = arith.constant 1152 : index
    %81 = vector.load %arg6[%c0_53, %c1152] : memref<8x1280xf32, #tpu.memory_space<vmem>>, vector<8x128xf32>
    %82 = arith.addf %80, %81 : vector<8x128xf32>
    %c0_54 = arith.constant 0 : index
    %c0_55 = arith.constant 0 : index
    %83 = vector.load %arg5[%c0_54, %c0_55] : memref<8x128xf32, #tpu.memory_space<vmem>>, vector<8x128xf32>
    tpu.vector_store %arg5[%c0_54, %c0_55], %82 {strides = array<i32>} : memref<8x128xf32, #tpu.memory_space<vmem>>, vector<8x128xf32>,
    return
  }
  func.func @transform_0(%arg0: i32) -> (i32, i32) {
    %c0_i32 = arith.constant 0 : i32
    %c0_i32_0 = arith.constant 0 : i32
    return %arg0, %c0_i32 : i32, i32
  }
  func.func @transform_1(%arg0: i32) -> (i32, i32) {
    %c0_i32 = arith.constant 0 : i32
    %c0_i32_0 = arith.constant 0 : i32
    return %arg0, %c0_i32 : i32, i32
  }
  func.func @transform_2(%arg0: i32) -> (i32, i32, i32) {
    %c0_i32 = arith.constant 0 : i32
    %c0_i32_0 = arith.constant 0 : i32
    %c0_i32_1 = arith.constant 0 : i32
    %c0_i32_2 = arith.constant 0 : i32
    return %c0_i32, %c0_i32_0, %c0_i32_1 : i32, i32, i32
  }
  func.func @transform_3(%arg0: i32) -> (i32, i32) {
    %c0_i32 = arith.constant 0 : i32
    %c0_i32_0 = arith.constant 0 : i32
    %c0_i32_1 = arith.constant 0 : i32
    return %c0_i32, %c0_i32_0 : i32, i32
  }
  func.func @transform_4(%arg0: i32) -> (i32, i32) {
    %c0_i32 = arith.constant 0 : i32
    %c0_i32_0 = arith.constant 0 : i32
    return %arg0, %c0_i32 : i32, i32
  }
}

module attributes {stable_mosaic.version = 11 : i64} {
  func.func @resforward_kernel(%arg0: i32, %arg1: memref<8x128xbf16, #tpu.memory_space<vmem>>, %arg2: memref<8x16xbf16, #tpu.memory_space<vmem>>, %arg3: memref<10x128x128xbf16, #tpu.memory_space<vmem>>, %arg4: memref<16x1280xbf16, #tpu.memory_space<vmem>>, %arg5: memref<8x128xf32, #tpu.memory_space<vmem>>, %arg6: memref<8x1280xf32, #tpu.memory_space<vmem>>) attributes {dimension_semantics = [#tpu.dimension_semantics<parallel>], iteration_bounds = array<i64: 2>, scalar_prefetch = 0 : i64, scratch_operands = 1 : i64, tpu.core_type = #tpu.core_type<tc>, window_params = [{transform_indices = @transform_0, window_bounds = array<i64: 8, 128>}, {transform_indices = @transform_1, window_bounds = array<i64: 8, 16>}, {pipeline_mode = #tpu.pipeline_mode<synchronous>, transform_indices = @transform_2, window_bounds = array<i64: 10, 128, 128>}, {pipeline_mode = #tpu.pipeline_mode<synchronous>, transform_indices = @transform_3, window_bounds = array<i64: 16, 1280>}, {transform_indices = @transform_4, window_bounds = array<i64: 8, 128>}]} {
    %c0 = arith.constant 0 : index
    %c0_0 = arith.constant 0 : index
    %0 = vector.load %arg2[%c0, %c0_0] : memref<8x16xbf16, #tpu.memory_space<vmem>>, vector<8x16xbf16>
    %c0_1 = arith.constant 0 : index
    %c0_2 = arith.constant 0 : index
    %1 = vector.load %arg4[%c0_1, %c0_2] : memref<16x1280xbf16, #tpu.memory_space<vmem>>, vector<16x1280xbf16>
    %cst = arith.constant dense<0.000000e+00> : vector<8x1280xf32>
    %2 = tpu.matmul %0, %1, %cst {dimension_numbers = #tpu.dot_dimension_numbers<[1], [0], [0], [1], [0, 0, 1, 1], [], []>} : vector<8x16xbf16>, vector<16x1280xbf16>, vector<8x1280xf32> -> vector<8x1280xf32>
    %c0_3 = arith.constant 0 : index
    %c0_4 = arith.constant 0 : index
    %3 = vector.load %arg6[%c0_3, %c0_4] : memref<8x1280xf32, #tpu.memory_space<vmem>>, vector<8x1280xf32>
    tpu.vector_store %arg6[%c0_3, %c0_4], %2 {strides = array<i32>} : memref<8x1280xf32, #tpu.memory_space<vmem>>, vector<8x1280xf32>,
    %c0_5 = arith.constant 0 : index
    %c0_6 = arith.constant 0 : index
    %4 = vector.load %arg1[%c0_5, %c0_6] : memref<8x128xbf16, #tpu.memory_space<vmem>>, vector<8x128xbf16>
    %c0_7 = arith.constant 0 : index
    %c0_8 = arith.constant 0 : index
    %c0_9 = arith.constant 0 : index
    %5 = vector.load %arg3[%c0_7, %c0_8, %c0_9] : memref<10x128x128xbf16, #tpu.memory_space<vmem>>, vector<1x128x128xbf16>
    %6 = vector.shape_cast %5 : vector<1x128x128xbf16> to vector<128x128xbf16>
    %cst_10 = arith.constant dense<0.000000e+00> : vector<8x128xf32>
    %7 = tpu.matmul %4, %6, %cst_10 {dimension_numbers = #tpu.dot_dimension_numbers<[1], [0], [0], [1], [0, 0, 1, 1], [], []>} : vector<8x128xbf16>, vector<128x128xbf16>, vector<8x128xf32> -> vector<8x128xf32>
    %c0_11 = arith.constant 0 : index
    %c0_12 = arith.constant 0 : index
    %8 = vector.load %arg6[%c0_11, %c0_12] : memref<8x1280xf32, #tpu.memory_space<vmem>>, vector<8x128xf32>
    %9 = arith.addf %7, %8 : vector<8x128xf32>
    %cst_13 = arith.constant 0.00999999977 : f32
    %10 = vector.broadcast %cst_13 : f32 to vector<8x128xf32>
    %11 = arith.mulf %10, %9 : vector<8x128xf32>
    %12 = arith.maximumf %9, %11 : vector<8x128xf32>
    %c1 = arith.constant 1 : index
    %c0_14 = arith.constant 0 : index
    %c0_15 = arith.constant 0 : index
    %13 = vector.load %arg3[%c1, %c0_14, %c0_15] : memref<10x128x128xbf16, #tpu.memory_space<vmem>>, vector<1x128x128xbf16>
    %14 = vector.shape_cast %13 : vector<1x128x128xbf16> to vector<128x128xbf16>
    %15 = arith.truncf %12 : vector<8x128xf32> to vector<8x128xbf16>
    %cst_16 = arith.constant dense<0.000000e+00> : vector<8x128xf32>
    %16 = tpu.matmul %15, %14, %cst_16 {dimension_numbers = #tpu.dot_dimension_numbers<[1], [0], [0], [1], [0, 0, 1, 1], [], []>} : vector<8x128xbf16>, vector<128x128xbf16>, vector<8x128xf32> -> vector<8x128xf32>
    %c0_17 = arith.constant 0 : index
    %c128 = arith.constant 128 : index
    %17 = vector.load %arg6[%c0_17, %c128] : memref<8x1280xf32, #tpu.memory_space<vmem>>, vector<8x128xf32>
    %18 = arith.addf %16, %17 : vector<8x128xf32>
    %cst_18 = arith.constant 0.00999999977 : f32
    %19 = vector.broadcast %cst_18 : f32 to vector<8x128xf32>
    %20 = arith.mulf %19, %18 : vector<8x128xf32>
    %21 = arith.maximumf %18, %20 : vector<8x128xf32>
    %c2 = arith.constant 2 : index
    %c0_19 = arith.constant 0 : index
    %c0_20 = arith.constant 0 : index
    %22 = vector.load %arg3[%c2, %c0_19, %c0_20] : memref<10x128x128xbf16, #tpu.memory_space<vmem>>, vector<1x128x128xbf16>
    %23 = vector.shape_cast %22 : vector<1x128x128xbf16> to vector<128x128xbf16>
    %24 = arith.truncf %21 : vector<8x128xf32> to vector<8x128xbf16>
    %cst_21 = arith.constant dense<0.000000e+00> : vector<8x128xf32>
    %25 = tpu.matmul %24, %23, %cst_21 {dimension_numbers = #tpu.dot_dimension_numbers<[1], [0], [0], [1], [0, 0, 1, 1], [], []>} : vector<8x128xbf16>, vector<128x128xbf16>, vector<8x128xf32> -> vector<8x128xf32>
    %c0_22 = arith.constant 0 : index
    %c256 = arith.constant 256 : index
    %26 = vector.load %arg6[%c0_22, %c256] : memref<8x1280xf32, #tpu.memory_space<vmem>>, vector<8x128xf32>
    %27 = arith.addf %25, %26 : vector<8x128xf32>
    %28 = arith.addf %27, %12 : vector<8x128xf32>
    %c3 = arith.constant 3 : index
    %c0_23 = arith.constant 0 : index
    %c0_24 = arith.constant 0 : index
    %29 = vector.load %arg3[%c3, %c0_23, %c0_24] : memref<10x128x128xbf16, #tpu.memory_space<vmem>>, vector<1x128x128xbf16>
    %30 = vector.shape_cast %29 : vector<1x128x128xbf16> to vector<128x128xbf16>
    %31 = arith.truncf %28 : vector<8x128xf32> to vector<8x128xbf16>
    %cst_25 = arith.constant dense<0.000000e+00> : vector<8x128xf32>
    %32 = tpu.matmul %31, %30, %cst_25 {dimension_numbers = #tpu.dot_dimension_numbers<[1], [0], [0], [1], [0, 0, 1, 1], [], []>} : vector<8x128xbf16>, vector<128x128xbf16>, vector<8x128xf32> -> vector<8x128xf32>
    %c0_26 = arith.constant 0 : index
    %c384 = arith.constant 384 : index
    %33 = vector.load %arg6[%c0_26, %c384] : memref<8x1280xf32, #tpu.memory_space<vmem>>, vector<8x128xf32>
    %34 = arith.addf %32, %33 : vector<8x128xf32>
    %cst_27 = arith.constant 0.00999999977 : f32
    %35 = vector.broadcast %cst_27 : f32 to vector<8x128xf32>
    %36 = arith.mulf %35, %34 : vector<8x128xf32>
    %37 = arith.maximumf %34, %36 : vector<8x128xf32>
    %c4 = arith.constant 4 : index
    %c0_28 = arith.constant 0 : index
    %c0_29 = arith.constant 0 : index
    %38 = vector.load %arg3[%c4, %c0_28, %c0_29] : memref<10x128x128xbf16, #tpu.memory_space<vmem>>, vector<1x128x128xbf16>
    %39 = vector.shape_cast %38 : vector<1x128x128xbf16> to vector<128x128xbf16>
    %40 = arith.truncf %37 : vector<8x128xf32> to vector<8x128xbf16>
    %cst_30 = arith.constant dense<0.000000e+00> : vector<8x128xf32>
    %41 = tpu.matmul %40, %39, %cst_30 {dimension_numbers = #tpu.dot_dimension_numbers<[1], [0], [0], [1], [0, 0, 1, 1], [], []>} : vector<8x128xbf16>, vector<128x128xbf16>, vector<8x128xf32> -> vector<8x128xf32>
    %c0_31 = arith.constant 0 : index
    %c512 = arith.constant 512 : index
    %42 = vector.load %arg6[%c0_31, %c512] : memref<8x1280xf32, #tpu.memory_space<vmem>>, vector<8x128xf32>
    %43 = arith.addf %41, %42 : vector<8x128xf32>
    %44 = arith.addf %43, %28 : vector<8x128xf32>
    %c5 = arith.constant 5 : index
    %c0_32 = arith.constant 0 : index
    %c0_33 = arith.constant 0 : index
    %45 = vector.load %arg3[%c5, %c0_32, %c0_33] : memref<10x128x128xbf16, #tpu.memory_space<vmem>>, vector<1x128x128xbf16>
    %46 = vector.shape_cast %45 : vector<1x128x128xbf16> to vector<128x128xbf16>
    %47 = arith.truncf %44 : vector<8x128xf32> to vector<8x128xbf16>
    %cst_34 = arith.constant dense<0.000000e+00> : vector<8x128xf32>
    %48 = tpu.matmul %47, %46, %cst_34 {dimension_numbers = #tpu.dot_dimension_numbers<[1], [0], [0], [1], [0, 0, 1, 1], [], []>} : vector<8x128xbf16>, vector<128x128xbf16>, vector<8x128xf32> -> vector<8x128xf32>
    %c0_35 = arith.constant 0 : index
    %c640 = arith.constant 640 : index
    %49 = vector.load %arg6[%c0_35, %c640] : memref<8x1280xf32, #tpu.memory_space<vmem>>, vector<8x128xf32>
    %50 = arith.addf %48, %49 : vector<8x128xf32>
    %cst_36 = arith.constant 0.00999999977 : f32
    %51 = vector.broadcast %cst_36 : f32 to vector<8x128xf32>
    %52 = arith.mulf %51, %50 : vector<8x128xf32>
    %53 = arith.maximumf %50, %52 : vector<8x128xf32>
    %c6 = arith.constant 6 : index
    %c0_37 = arith.constant 0 : index
    %c0_38 = arith.constant 0 : index
    %54 = vector.load %arg3[%c6, %c0_37, %c0_38] : memref<10x128x128xbf16, #tpu.memory_space<vmem>>, vector<1x128x128xbf16>
    %55 = vector.shape_cast %54 : vector<1x128x128xbf16> to vector<128x128xbf16>
    %56 = arith.truncf %53 : vector<8x128xf32> to vector<8x128xbf16>
    %cst_39 = arith.constant dense<0.000000e+00> : vector<8x128xf32>
    %57 = tpu.matmul %56, %55, %cst_39 {dimension_numbers = #tpu.dot_dimension_numbers<[1], [0], [0], [1], [0, 0, 1, 1], [], []>} : vector<8x128xbf16>, vector<128x128xbf16>, vector<8x128xf32> -> vector<8x128xf32>
    %c0_40 = arith.constant 0 : index
    %c768 = arith.constant 768 : index
    %58 = vector.load %arg6[%c0_40, %c768] : memref<8x1280xf32, #tpu.memory_space<vmem>>, vector<8x128xf32>
    %59 = arith.addf %57, %58 : vector<8x128xf32>
    %60 = arith.addf %59, %44 : vector<8x128xf32>
    %c7 = arith.constant 7 : index
    %c0_41 = arith.constant 0 : index
    %c0_42 = arith.constant 0 : index
    %61 = vector.load %arg3[%c7, %c0_41, %c0_42] : memref<10x128x128xbf16, #tpu.memory_space<vmem>>, vector<1x128x128xbf16>
    %62 = vector.shape_cast %61 : vector<1x128x128xbf16> to vector<128x128xbf16>
    %63 = arith.truncf %60 : vector<8x128xf32> to vector<8x128xbf16>
    %cst_43 = arith.constant dense<0.000000e+00> : vector<8x128xf32>
    %64 = tpu.matmul %63, %62, %cst_43 {dimension_numbers = #tpu.dot_dimension_numbers<[1], [0], [0], [1], [0, 0, 1, 1], [], []>} : vector<8x128xbf16>, vector<128x128xbf16>, vector<8x128xf32> -> vector<8x128xf32>
    %c0_44 = arith.constant 0 : index
    %c896 = arith.constant 896 : index
    %65 = vector.load %arg6[%c0_44, %c896] : memref<8x1280xf32, #tpu.memory_space<vmem>>, vector<8x128xf32>
    %66 = arith.addf %64, %65 : vector<8x128xf32>
    %cst_45 = arith.constant 0.00999999977 : f32
    %67 = vector.broadcast %cst_45 : f32 to vector<8x128xf32>
    %68 = arith.mulf %67, %66 : vector<8x128xf32>
    %69 = arith.maximumf %66, %68 : vector<8x128xf32>
    %c8 = arith.constant 8 : index
    %c0_46 = arith.constant 0 : index
    %c0_47 = arith.constant 0 : index
    %70 = vector.load %arg3[%c8, %c0_46, %c0_47] : memref<10x128x128xbf16, #tpu.memory_space<vmem>>, vector<1x128x128xbf16>
    %71 = vector.shape_cast %70 : vector<1x128x128xbf16> to vector<128x128xbf16>
    %72 = arith.truncf %69 : vector<8x128xf32> to vector<8x128xbf16>
    %cst_48 = arith.constant dense<0.000000e+00> : vector<8x128xf32>
    %73 = tpu.matmul %72, %71, %cst_48 {dimension_numbers = #tpu.dot_dimension_numbers<[1], [0], [0], [1], [0, 0, 1, 1], [], []>} : vector<8x128xbf16>, vector<128x128xbf16>, vector<8x128xf32> -> vector<8x128xf32>
    %c0_49 = arith.constant 0 : index
    %c1024 = arith.constant 1024 : index
    %74 = vector.load %arg6[%c0_49, %c1024] : memref<8x1280xf32, #tpu.memory_space<vmem>>, vector<8x128xf32>
    %75 = arith.addf %73, %74 : vector<8x128xf32>
    %76 = arith.addf %75, %60 : vector<8x128xf32>
    %c9 = arith.constant 9 : index
    %c0_50 = arith.constant 0 : index
    %c0_51 = arith.constant 0 : index
    %77 = vector.load %arg3[%c9, %c0_50, %c0_51] : memref<10x128x128xbf16, #tpu.memory_space<vmem>>, vector<1x128x128xbf16>
    %78 = vector.shape_cast %77 : vector<1x128x128xbf16> to vector<128x128xbf16>
    %79 = arith.truncf %76 : vector<8x128xf32> to vector<8x128xbf16>
    %cst_52 = arith.constant dense<0.000000e+00> : vector<8x128xf32>
    %80 = tpu.matmul %79, %78, %cst_52 {dimension_numbers = #tpu.dot_dimension_numbers<[1], [0], [0], [1], [0, 0, 1, 1], [], []>} : vector<8x128xbf16>, vector<128x128xbf16>, vector<8x128xf32> -> vector<8x128xf32>
    %c0_53 = arith.constant 0 : index
    %c1152 = arith.constant 1152 : index
    %81 = vector.load %arg6[%c0_53, %c1152] : memref<8x1280xf32, #tpu.memory_space<vmem>>, vector<8x128xf32>
    %82 = arith.addf %80, %81 : vector<8x128xf32>
    %c0_54 = arith.constant 0 : index
    %c0_55 = arith.constant 0 : index
    %83 = vector.load %arg5[%c0_54, %c0_55] : memref<8x128xf32, #tpu.memory_space<vmem>>, vector<8x128xf32>
    tpu.vector_store %arg5[%c0_54, %c0_55], %82 {strides = array<i32>} : memref<8x128xf32, #tpu.memory_space<vmem>>, vector<8x128xf32>,
    return
  }
  func.func @transform_0(%arg0: i32) -> (i32, i32) {
    %c0_i32 = arith.constant 0 : i32
    %c0_i32_0 = arith.constant 0 : i32
    return %arg0, %c0_i32 : i32, i32
  }
  func.func @transform_1(%arg0: i32) -> (i32, i32) {
    %c0_i32 = arith.constant 0 : i32
    %c0_i32_0 = arith.constant 0 : i32
    return %arg0, %c0_i32 : i32, i32
  }
  func.func @transform_2(%arg0: i32) -> (i32, i32, i32) {
    %c0_i32 = arith.constant 0 : i32
    %c0_i32_0 = arith.constant 0 : i32
    %c0_i32_1 = arith.constant 0 : i32
    %c0_i32_2 = arith.constant 0 : i32
    return %c0_i32, %c0_i32_0, %c0_i32_1 : i32, i32, i32
  }
  func.func @transform_3(%arg0: i32) -> (i32, i32) {
    %c0_i32 = arith.constant 0 : i32
    %c0_i32_0 = arith.constant 0 : i32
    %c0_i32_1 = arith.constant 0 : i32
    return %c0_i32, %c0_i32_0 : i32, i32
  }
  func.func @transform_4(%arg0: i32) -> (i32, i32) {
    %c0_i32 = arith.constant 0 : i32
    %c0_i32_0 = arith.constant 0 : i32
    return %arg0, %c0_i32 : i32, i32
  }
}

</mosaic_0001>

<bundles_post_ra>
// kernel: tpu_custom_call.1
= control target key start
LH: loop header
LB: loop body
LE: loop exit
PB: predicated region body
PF: predicated region fallthrough
CT: control target
= control target key end

     0   :  { %s2998_s0 = inlined_call_operand.hbm [shape: bf16[16,128], index: 0, kind: input, shape index: {}]   ;;  %s2999_s1 = inlined_call_operand.hbm [shape: bf16[16,16], index: 1, kind: input, shape index: {}]   ;;  %s3000_s2 = inlined_call_operand.hbm [shape: bf16[10,128,128], index: 2, kind: input, shape index: {}]   ;;  %s3001_s3 = inlined_call_operand.hbm [shape: bf16[16,1280], index: 3, kind: input, shape index: {}]   ;;  %s3002_s4 = inlined_call_operand.hbm [shape: f32[16,128], index: 4, kind: output, shape index: {}]  }
   0x1   :  { %3007 = sst [smem:[#allocation17_spill]] %s3000_s2 }
   0x2   :  { %9 = vsyncpa [#allocation4], 0 }
   0x3   :  { %11 = vsyncpa [#allocation4 + $0x1], 0 }
   0x4   :  { %12 = vsyncpa [#allocation7], 0 }
   0x5   :  { %14 = vsyncpa [#allocation7 + $0x1], 0 }
   0x6   :  { %15 = vsyncpa [#allocation10], 0 }
   0x7   :  { %16 = vsyncpa [#allocation5], 0 }
   0x8   :  { %18 = vsyncpa [#allocation5 + $0x1], 0  ;;  %s2581_s15 = smov 0   ;;  %s2583_s16 = smov 0  }
   0x9   :  { %s2585_s17 = smov 0   ;;  %s2587_s18 = smov 0  }
   0xa LB: > { %s2602_s19 = sadd.s32 4294967295, %s2542_s18   ;;  %s1770_s20 = sadd.s32 4294967294, %s2542_s18   ;;  %s2542_s18 = sphi %s2587_s18, %s3028_s18   ;;  %s2538_s17 = sphi %s2585_s17, %s3027_s17   ;;  %s2534_s16 = sphi %s2583_s16, %s3026_s16   ;;  %s2530_s15 = sphi %s2581_s15, %s3025_s15  }
   0xb   : > { %p44_p0 = scmp.ne.s32.totalorder %s2534_s16, %s2530_s15  ;;  %p3003_p1 = scmp.eq.s32.totalorder %s2602_s19, 0 }
   0xc   : > { %p142_p3 = scmp.eq.s32.totalorder %s1770_s20, 1  ;;  %p1771_p5 = scmp.ge.s32.totalorder %s2542_s18, 1 }
   0xd   : > { %p2611_p4 = por %p3003_p1, %p44_p0  ;;  %p149_p7 = scmp.lt.s32.totalorder %s2542_s18, 3 }
   0xe   : > { %p2616_p6 = por %p142_p3, %p44_p0  ;;  %s2544_s24 = smov [#allocation8]  }
   0xf   : > { %s3008_s21 = scalar_select %p2611_p4, 1, 0 }
  0x10   : > { %s3009_s22 = scalar_select %p2616_p6, 1, 0 }
  0x11   : > { %p2621_p8 = pnand %p1771_p5, %p149_p7  ;;  %s161_s25 = sshll.u32 %s2544_s24, 4  ;;  %s2625_s25 = int_to_ptr.vmem [resolvable:$true] %s161_s25 }
  0x12   : > { %s2545_s27 = smov [#allocation9]   ;;  %s3012_s2 = sld [smem:[#allocation17_spill]] }
  0x13   : > { %s3010_s23 = scalar_select %p2621_p8, 1, 0 }
  0x14   : > { %p2188_p9 = pneg %p2621_p8  ;;  %s174_s28 = sshll.u32 %s2545_s27, 4  ;;  %s2636_s28 = int_to_ptr.vmem [resolvable:$true] %s174_s28 }
  0x16   : > { %p2632_p11 = pnand %p2188_p9, %p3003_p1 }
  0x18   : > { %s2348_s5 = scalar_lea.hbm %s3012_s2, 10240  ;;  %p2350_p13 = pneg %p2632_p11 }
  0x19   : > { %p2349_p12 = scmp.ne.s32.totalorder %s3012_s2, %s2348_s5  ;;  %p2355_p5 = scmp.lt.u32.totalorder %s2348_s5, %s3012_s2 }
  0x1b   : > { %p2351_p0 = pnand %p2350_p13, %p2349_p12 }
  0x1d   : > { %p2352_p3 = pneg %p2351_p0 }
  0x1f   : > { %p2357_p7 = pnand %p2355_p5, %p2352_p3 }
  0x21   : > { %2360 = shalt.err (!%p2357_p7)
}
  0x22   : > { %s2361_s10 = scalar_lea.vmem %s2625_s25, 10240  ;;  %p2369_p2 = scmp.lt.s32.totalorder %s2625_s25, %s2625_s25 }
  0x23   : > { %p2362_p9 = scmp.ne.s32.totalorder %s2625_s25, %s2361_s10  ;;  %p2370_p12 = scmp.lt.s32.totalorder %s2361_s10, %s2361_s10 }
  0x25   : > { %p2364_p10 = pnand %p2362_p9, %p2350_p13  ;;  %p2371_p0 = por %p2370_p12, %p2369_p2 }
  0x27   : > { %p2365_p1 = pneg %p2364_p10 }
  0x29   : > { %p2372_p6 = pnand %p2371_p0, %p2365_p1 }
  0x2b   : > { %2375 = shalt.err (!%p2372_p6)
}
  0x2c   : > { %s2546_s11 = smov 64   ;;  %s2547_s12 = smov 4  }
  0x2d   : > { %2191 = dma.hbm_to_vmem [thread:$0]  (!%p2632_p11), %s3012_s2, 10240, %s2625_s25, [#allocation7], %s2546_s11, %s2546_s11, %s2547_s12  }
  0x2e   : > { %s2376_s27 = scalar_lea.hbm %s3001_s3, 1280 }
  0x2f   : > { %p2377_p2 = scmp.ne.s32.totalorder %s3001_s3, %s2376_s27  ;;  %p2383_p10 = scmp.lt.u32.totalorder %s2376_s27, %s3001_s3 }
  0x31   : > { %p2379_p1 = pnand %p2377_p2, %p2350_p13 }
  0x33   : > { %p2380_p6 = pneg %p2379_p1 }
  0x35   : > { %p2385_p3 = pnand %p2383_p10, %p2380_p6 }
  0x37   : > { %2388 = shalt.err (!%p2385_p3)
}
  0x38   : > { %s2389_s25 = scalar_lea.vmem %s2636_s28, 1280  ;;  %p2397_p12 = scmp.lt.s32.totalorder %s2636_s28, %s2636_s28 }
  0x39   : > { %p2390_p5 = scmp.ne.s32.totalorder %s2636_s28, %s2389_s25  ;;  %p2398_p0 = scmp.lt.s32.totalorder %s2389_s25, %s2389_s25 }
  0x3b   : > { %p2392_p7 = pnand %p2390_p5, %p2350_p13  ;;  %p2399_p2 = por %p2398_p0, %p2397_p12 }
  0x3d   : > { %p2393_p9 = pneg %p2392_p7 }
  0x3f   : > { %p2400_p1 = pnand %p2399_p2, %p2393_p9 }
  0x41   : > { %2403 = shalt.err (!%p2400_p1)
}
  0x42   : > { %s2548_s7 = smov 640   ;;  %s2549_s8 = smov 40  }
  0x43   : > { %2194 = dma.hbm_to_vmem [thread:$0]  (!%p2632_p11), %s3001_s3, 1280, %s2636_s28, [#allocation10], %s2548_s7, %s2548_s7, %s2549_s8  }
  0x44   : > { %s2691_s11 = sadd.s32 1, %s2542_s18   ;;  %s31_s13 = sadd.s32 1, %s2538_s17 }
  0x45   : > { %s28_s12 = ssub.s32 %s2542_s18, %s2691_s11  ;;  %p38_p6 = scmp.ne.s32.totalorder %s2538_s17, %s2534_s16 }
  0x46   : > { %p29_p13 = scmp.eq.s32.totalorder %s28_s12, 0  ;;  %p39_p10 = scmp.eq.s32.totalorder %s2542_s18, 0 }
  0x47   : > { %p3013_p5 = scmp.eq.s32.totalorder %s2602_s19, 1  ;;  %p2208_p9 = scmp.lt.s32.totalorder %s2542_s18, 2 }
  0x48   : > { %s2700_s14 = scalar_select %p29_p13, %s2538_s17, %s31_s13  }
  0x49   : > { %p40_p3 = por %p39_p10, %p38_p6  ;;  %p2704_p7 = por %p3013_p5, %p38_p6 }
  0x4a   : > { %s188_s26 = sand.u32 1, %s2538_s17   ;;  %s1776_s24 = sshll.u32 %s2542_s18, 6 }
  0x4b   : > { %s3014_s20 = scalar_select %p2704_p7, 1, 0 }
  0x4c   : > { %s2710_s28 = sshll.u32 %s188_s26, 2  ;;  %s2716_s30 = scalar_lea.hbm %s2998_s0, %s1776_s24 }
  0x4d   : > { %s192_s5 = scalar_lea.vmem [#allocation3], %s2710_s28  ;;  %p2721_p11 = pnand %p2208_p9, %p40_p3 }
  0x4e   : > { %s199_s6 = sshll.u32 %s192_s5, 4  ;;  %s2728_s9 = scalar_lea.hbm %s2999_s1, %s1776_s24  ;;  %s2719_s6 = int_to_ptr.vmem [resolvable:$true] %s199_s6 }
  0x4f   : > { %s206_s10 = sand.u32 1, %s2542_s18   ;;  %s189_s12 = scalar_lea.sflag [#allocation4], %s188_s26 }
  0x50   : > { %s2404_s13 = scalar_lea.hbm %s2716_s30, 64  ;;  %p2406_p0 = pneg %p2721_p11 }
  0x51   : > { %p2405_p12 = scmp.ne.s32.totalorder %s2716_s30, %s2404_s13  ;;  %s2409_s5 = scalar_lea.hbm %s2998_s0, 128 }
  0x52   : > { %p2410_p13 = scmp.lt.u32.totalorder %s2716_s30, %s2998_s0  ;;  %p2411_p6 = scmp.lt.u32.totalorder %s2409_s5, %s2404_s13 }
  0x53   : > { %p2407_p2 = pnand %p2406_p0, %p2405_p12  ;;  %p2413_p3 = scmp.lt.u32.totalorder %s2404_s13, %s2716_s30 }
  0x54   : > { %p2412_p10 = por %p2411_p6, %p2410_p13 }
  0x55   : > { %p2408_p1 = pneg %p2407_p2 }
  0x56   : > { %p2414_p5 = por %p2413_p3, %p2412_p10 }
  0x58   : > { %p2415_p9 = pnand %p2414_p5, %p2408_p1 }
  0x5a   : > { %2418 = shalt.err (!%p2415_p9)
}
  0x5b   : > { %s2419_s26 = scalar_lea.vmem %s2719_s6, 64  ;;  %s2550_s24 = smov [#allocation3]  }
  0x5c   : > { %p2420_p12 = scmp.ne.s32.totalorder %s2719_s6, %s2419_s26  ;;  %s2424_s8 = sshll.u32 %s2550_s24, 4  ;;  %s2425_s8 = int_to_ptr.vmem [resolvable:$false] %s2424_s8 }
  0x5d   : > { %s2426_s2 = scalar_lea.vmem %s2425_s8, 128  ;;  %p2427_p4 = scmp.lt.s32.totalorder %s2719_s6, %s2425_s8 }
  0x5e   : > { %p2422_p2 = pnand %p2420_p12, %p2406_p0  ;;  %p2428_p13 = scmp.lt.s32.totalorder %s2426_s2, %s2419_s26 }
  0x60   : > { %p2423_p7 = pneg %p2422_p2  ;;  %p2429_p6 = por %p2428_p13, %p2427_p4 }
  0x62   : > { %p2430_p10 = pnand %p2429_p6, %p2423_p7 }
  0x64   : > { %2433 = shalt.err (!%p2430_p10)
}
  0x65   : > { %2198 = dma.hbm_to_vmem [thread:$0]  (!%p2721_p11), %s2716_s30, 64, %s2719_s6, %s189_s12  }
  0x66   : > { %s210_s13 = scalar_lea.vmem [#allocation6], %s2710_s28  ;;  %s207_s29 = scalar_lea.sflag [#allocation7], %s206_s10 }
  0x67   : > { %s217_s27 = sshll.u32 %s210_s13, 4  ;;  %s2434_s5 = scalar_lea.hbm %s2728_s9, 64  ;;  %s218_s27 = int_to_ptr.vmem [resolvable:$true] %s217_s27 }
  0x68   : > { %p2435_p4 = scmp.ne.s32.totalorder %s2728_s9, %s2434_s5  ;;  %s2439_s24 = scalar_lea.hbm %s2999_s1, 128 }
  0x69   : > { %p2440_p3 = scmp.lt.u32.totalorder %s2728_s9, %s2999_s1  ;;  %p2441_p5 = scmp.lt.u32.totalorder %s2439_s24, %s2434_s5 }
  0x6a   : > { %p2437_p7 = pnand %p2435_p4, %p2406_p0  ;;  %p2443_p12 = scmp.lt.u32.totalorder %s2434_s5, %s2728_s9 }
  0x6b   : > { %p2442_p9 = por %p2441_p5, %p2440_p3 }
  0x6c   : > { %p2438_p1 = pneg %p2437_p7 }
  0x6d   : > { %p2444_p2 = por %p2443_p12, %p2442_p9 }
  0x6f   : > { %p2445_p13 = pnand %p2444_p2, %p2438_p1 }
  0x71   : > { %2448 = shalt.err (!%p2445_p13)
}
  0x72   : > { %s2449_s28 = scalar_lea.vmem %s218_s27, 64  ;;  %s2551_s30 = smov [#allocation6]  }
  0x73   : > { %p2450_p6 = scmp.ne.s32.totalorder %s218_s27, %s2449_s28  ;;  %s2454_s6 = sshll.u32 %s2551_s30, 4  ;;  %s2455_s6 = int_to_ptr.vmem [resolvable:$false] %s2454_s6 }
  0x74   : > { %s2456_s10 = scalar_lea.vmem %s2455_s6, 128  ;;  %p2457_p7 = scmp.lt.s32.totalorder %s218_s27, %s2455_s6 }
  0x75   : > { %p2452_p10 = pnand %p2450_p6, %p2406_p0  ;;  %p2458_p8 = scmp.lt.s32.totalorder %s2456_s10, %s2449_s28 }
  0x77   : > { %p2453_p4 = pneg %p2452_p10  ;;  %p2459_p3 = por %p2458_p8, %p2457_p7 }
  0x79   : > { %p2460_p5 = pnand %p2459_p3, %p2453_p4 }
  0x7b   : > { %2463 = shalt.err (!%p2460_p5)
}
  0x7c   : > { %2201 = dma.hbm_to_vmem [thread:$0]  (!%p2721_p11), %s2728_s9, 64, %s218_s27, %s207_s29  }
  0x7d   : > { %p3016_p1 = scmp.ne.s32.totalorder %s3010_s23, 0 }
  0x7e   : > { %s2781_s12 = sand.u32 (!%p3016_p1), 1, %s2534_s16   ;;  %p3017_p8 = scmp.ne.s32.totalorder (!%p3016_p1), %s3008_s21, 0 }
  0x7f   : > { %226 = sbr.rel (%p3016_p1) target bundleno = 2391 (0x957), region = 36  ;;  %s1780_s13 = sshll.u32 (!%p3016_p1), %s2781_s12, 2 }
  0x80   : > { %s229_s5 = scalar_lea.sflag (!%p3016_p1), [#allocation4], %s2781_s12  ;;  %s2785_s7 = scalar_lea.vmem (!%p3016_p1), [#allocation3], %s1780_s13 }
  0x86   : > { %2509 = dma.done.wait (%p3017_p8), %s229_s5, 64  }
  0x87   : > { %2511 = vsyncadd (%p3017_p8), %s229_s5, 4294967232  ;;  %s237_s25 = sand.u32 1, %s2602_s19   ;;  %s241_s9 = scalar_lea.vmem [#allocation6], %s1780_s13 }
  0x88   : > { %s238_s23 = scalar_lea.sflag [#allocation7], %s237_s25 }
  0x89   : > { %2513 = dma.done.wait (%p3017_p8), %s238_s23, 64  }
  0x8a   : > { %2515 = vsyncadd (%p3017_p8), %s238_s23, 4294967232  ;;  %p3018_p11 = scmp.eq.s32.totalorder %s2602_s19, 0 }
  0x8c   : > { %2517 = dma.done.wait (%p3018_p11), [#allocation7], 10240   ;;  %p3019_p0 = pmov %p3018_p11 }
  0x8e   : > { %2519 = vsyncadd (%p3019_p0), [#allocation7], 4294957056  ;;  %p3020_p9 = pmov %p3019_p0 }
  0x8f   : > { %p3021_p12 = pmov %p3019_p0 }
  0x90   : > { %2521 = dma.done.wait (%p3020_p9), [#allocation10], 1280  }
  0x91   : > { %2523 = vsyncadd (%p3021_p12), [#allocation10], 4294966016  ;;  %v2552_v0 = vmov 0   ;;  %v2253_v1 = vld [vmem:[#allocation9 + $0xc] ss:$40 sps:$4 sm:$0xff]   ;;  %vm341_vm0 = vcmask 130048  }
  0x92   : > { %418 = vmatprep.mubr.bf16.mxu1 %v2552_v0  ;;  %377 = vmatprep.mubr.bf16.mxu0 %v2552_v0  ;;  %v2255_v2 = vld [vmem:[#allocation9 + $0x8] ss:$40 sps:$4 sm:$0xff]   ;;  %v280_v3 = vld [vmem:[%s241_s9] sm:$0xf]  ;;  %v2553_v6 = vmov 0.0   ;;  %v2259_v7 = vld [vmem:[#allocation8] sm:$0xff]  }
  0x93   : > { %386 = vmatprep.subr.bf16.mxu1 %v2253_v1  ;;  %v2258_v4 = vld [vmem:[#allocation9 + $0x1c] ss:$40 sps:$4 sm:$0xff]   ;;  %v2256_v5 = vld [vmem:[#allocation9 + $0x18] ss:$40 sps:$4 sm:$0xff]   ;;  %v2260_v10 = vld [vmem:[#allocation8 + $0x8] sm:$0xff]   ;;  %vm2554_vm1 = vmmov 0  }
  0x94   : > { %387 = vmatpush1.bf16.msra.mxu1 %v2255_v2  ;;  %v2266_v8 = vld [vmem:[#allocation9 + $0x4] ss:$40 sps:$4 sm:$0xff]   ;;  %v2268_v9 = vld [vmem:[#allocation9] ss:$40 sps:$4 sm:$0xff]   ;;  %v2261_v11 = vld [vmem:[#allocation8 + $0x10] sm:$0xff]   ;;  %s1784_s21 = sshll.u32 %s2781_s12, 3 }
  0x95   : > { %468 = vmatprep.subr.bf16.mxu1 %v2258_v4  ;;  %345 = vmatprep.subr.bf16.mxu0 %v2266_v8  ;;  %v2262_v12 = vld [vmem:[#allocation8 + $0x18] sm:$0xff]   ;;  %v2263_v13 = vld [vmem:[#allocation8 + $0x20] sm:$0xff]   ;;  %v2264_v14 = vld [vmem:[#allocation8 + $0x28] sm:$0xff]   ;;  %s1881_s27 = sshll.u32 %s2602_s19, 7  ;;  %s278_s29 = scalar_lea.vmem [#allocation11], %s1784_s21 }
  0x96   : > { %346 = vmatpush1.bf16.msra.mxu0 %v2268_v9  ;;  %v2265_v15 = vld [vmem:[#allocation8 + $0x30] sm:$0xff]   ;;  %v2269_v16 = vld [vmem:[#allocation8 + $0x38] sm:$0xff]   ;;  %v2273_v20 = vld [vmem:[#allocation9 + $0x20] ss:$40 sps:$4 sm:$0xff]   ;;  %s1658_s26 = sshll.u32 %s278_s29, 4  ;;  %s2954_s2 = scalar_lea.hbm %s3002_s4, %s1881_s27  ;;  %s2956_s26 = int_to_ptr.vmem [resolvable:$true] %s1658_s26 }
  0x97   : > { %1796 = vmatmul.mubr.msk.bf16.vlgmr.msra.gmra.mrb[0].mxu1 %vm341_vm0, %v280_v3  ;;  %v560_v17 = vld [vmem:[%s2785_s7] sm:$0xf]  ;;  %v2275_v21 = vld [vmem:[#allocation9 + $0x24] ss:$40 sps:$4 sm:$0xff]   ;;  %v2279_v25 = vld [vmem:[#allocation8 + $0x58] sm:$0xff]   ;;  %s1645_s19 = scalar_lea.sflag [#allocation5], %s2781_s12 }
  0x98   : > { %469 = vmatpush1.bf16.msra.mxu1 %v2256_v5  ;;  %500 = vmatprep.mubr.bf16.mxu1 %v2552_v0  ;;  %v2270_v18 = vld [vmem:[#allocation9 + $0x10] ss:$40 sps:$4 sm:$0xff]   ;;  %v2272_v19 = vld [vmem:[#allocation9 + $0x14] ss:$40 sps:$4 sm:$0xff]   ;;  %v2276_v22 = vld [vmem:[#allocation8 + $0x40] sm:$0xff]   ;;  %s2464_s28 = scalar_lea.vmem %s2956_s26, 128 }
  0x99   : > { %1974 = vmatprep.subr.bf16.mxu1 %v2553_v6  ;;  %1795 = vmatmul.mubr.msk.bf16.vlgmr.msra.gmra.mrb[0].mxu0 %vm341_vm0, %v280_v3  ;;  %v2277_v23 = vld [vmem:[#allocation8 + $0x48] sm:$0xff]   ;;  %v2278_v24 = vld [vmem:[#allocation8 + $0x50] sm:$0xff]   ;;  %v2280_v26 = vld [vmem:[#allocation8 + $0x60] sm:$0xff]   ;;  %p2465_p2 = scmp.ne.s32.totalorder %s2956_s26, %s2464_s28  ;;  %p3022_p13 = scmp.ne.s32.totalorder %s3014_s20, 0 }
  0x9a   : > { %459 = vmatprep.mubr.bf16.mxu0 %v2552_v0  ;;  %427 = vmatprep.subr.bf16.mxu0 %v2272_v19  ;;  %v2281_v27 = vld [vmem:[#allocation8 + $0x68] sm:$0xff]   ;;  %v2282_v28 = vld [vmem:[#allocation8 + $0x70] sm:$0xff]   ;;  %v2283_v29 = vld [vmem:[#allocation8 + $0x78] sm:$0xff]   ;;  %s2555_s30 = smov [#allocation11]  }
  0x9b   : > { %428 = vmatpush1.bf16.msra.mxu0 %v2270_v18  ;;  %v2284_v30 = vld [vmem:[#allocation8 + $0x80] sm:$0xff]   ;;  %v2285_v31 = vld [vmem:[#allocation8 + $0x88] sm:$0xff]   ;;  %v2286_v32 = vld [vmem:[#allocation8 + $0x90] sm:$0xff]   ;;  %p2466_p6 = pnand %p2465_p2, %p3022_p13  ;;  %s2468_s6 = sshll.u32 %s2555_s30, 4  ;;  %s2469_s6 = int_to_ptr.vmem [resolvable:$false] %s2468_s6 }
  0x9c   : > { %509 = vmatprep.subr.bf16.mxu0 %v2275_v21  ;;  %v2287_v33 = vld [vmem:[#allocation8 + $0x98] sm:$0xff]   ;;  %v2288_v34 = vld [vmem:[#allocation8 + $0xa0] sm:$0xff]   ;;  %v2289_v35 = vld [vmem:[#allocation8 + $0xa8] sm:$0xff]   ;;  %s2470_s10 = scalar_lea.vmem %s2469_s6, 256  ;;  %p2471_p4 = scmp.lt.s32.totalorder %s2956_s26, %s2469_s6 }
  0x9d   : > { %v2291_v1 = vld [vmem:[#allocation8 + $0xb8] sm:$0xff]   ;;  %v2292_v2 = vld [vmem:[#allocation8 + $0xc0] sm:$0xff]   ;;  %v2294_v4 = vld [vmem:[#allocation8 + $0xd0] sm:$0xff]   ;;  %p2467_p10 = pneg %p2466_p6  ;;  %p2472_p7 = scmp.lt.s32.totalorder %s2470_s10, %s2464_s28 }
  0x9e   : > { %v2295_v5 = vld [vmem:[#allocation8 + $0xd8] sm:$0xff]   ;;  %v2297_v8 = vld [vmem:[#allocation8 + $0xe8] sm:$0xff]   ;;  %v2300_v19 = vld [vmem:[#allocation8 + $0x100] sm:$0xff]  }
  0x9f   : > { %1798 = vmatmul.mubr.msk.bf16.vlgmr.msra.gmra.mrb[4].mxu1 %vm341_vm0, %v280_v3  ;;  %v2299_v18 = vld [vmem:[#allocation8 + $0xf8] sm:$0xff]   ;;  %v2302_v21 = vld [vmem:[#allocation8 + $0x110] sm:$0xff]   ;;  %p2473_p3 = por %p2472_p7, %p2471_p4 }
  0xa0   : > { %1975 = vmatpush3.bf16.msra.mxu1 %v2259_v7  ;;  %1990 = vmatprep.mubr.msk.bf16.mxu1 %vm2554_vm1, %v2553_v6  ;;  %v2296_v7 = vld [vmem:[#allocation8 + $0xe0] sm:$0xff]  }
  0xa1   : > { %1976 = vmatprep.subr.bf16.mxu1 %v2553_v6  ;;  %1797 = vmatmul.mubr.msk.bf16.vlgmr.msra.gmra.mrb[4].mxu0 %vm341_vm0, %v280_v3  ;;  %p2474_p5 = pnand %p2473_p3, %p2467_p10 }
  0xa2   : > { %541 = vmatprep.mubr.bf16.mxu0 %v2552_v0  ;;  %510 = vmatpush1.bf16.msra.mxu0 %v2273_v20  ;;  %v2290_v0 = vld [vmem:[#allocation8 + $0xb0] sm:$0xff]   ;;  %v2301_v20 = vld [vmem:[#allocation8 + $0x108] sm:$0xff]  }
  0xa3   : > { %1994 = vmatprep.subr.bf16.mxu0 %v2553_v6 }
  0xa4   : > { %1977 = vmatpush3.bf16.msra.mxu1 %v2260_v10 }
  0xa5   : > { %1978 = vmatprep.subr.bf16.mxu1 %v2553_v6 }
  0xa8   : > { %1979 = vmatpush3.bf16.msra.mxu1 %v2261_v11 }
  0xa9   : > { %1980 = vmatprep.subr.bf16.mxu1 %v2553_v6  ;;  %1799 = vmatmul.mubr.msk.bf16.vlgmr.msra.gmra.mrb[8].mxu0 %vm341_vm0, %v280_v3  ;;  %v2293_v3 = vld [vmem:[#allocation8 + $0xc8] sm:$0xff]  }
  0xaa   : > { %1995 = vmatpush3.bf16.msra.mxu0 %v2276_v22  ;;  %2010 = vmatprep.mubr.msk.bf16.mxu0 %vm2554_vm1, %v2553_v6  ;;  %v2303_v22 = vld [vmem:[#allocation8 + $0x118] sm:$0xff]  }
  0xab   : > { %1996 = vmatprep.subr.bf16.mxu0 %v2553_v6 }
  0xac   : > { %1981 = vmatpush3.bf16.msra.mxu1 %v2262_v12 }
  0xad   : > { %1982 = vmatprep.subr.bf16.mxu1 %v2553_v6 }
  0xae   : > { %1997 = vmatpush3.bf16.msra.mxu0 %v2277_v23  ;;  %v2304_v23 = vld [vmem:[#allocation8 + $0x120] sm:$0xff]  }
  0xaf   : > { %1998 = vmatprep.subr.bf16.mxu0 %v2553_v6 }
  0xb0   : > { %1983 = vmatpush3.bf16.msra.mxu1 %v2263_v13 }
  0xb1   : > { %1984 = vmatprep.subr.bf16.mxu1 %v2553_v6 }
  0xb2   : > { %1999 = vmatpush3.bf16.msra.mxu0 %v2278_v24  ;;  %v2305_v24 = vld [vmem:[#allocation8 + $0x128] sm:$0xff]  }
  0xb3   : > { %2000 = vmatprep.subr.bf16.mxu0 %v2553_v6 }
  0xb4   : > { %1985 = vmatpush3.bf16.msra.mxu1 %v2264_v14 }
  0xb5   : > { %1986 = vmatprep.subr.bf16.mxu1 %v2553_v6 }
  0xb6   : > { %2001 = vmatpush3.bf16.msra.mxu0 %v2279_v25 }
  0xb7   : > { %2002 = vmatprep.subr.bf16.mxu0 %v2553_v6 }
  0xb8   : > { %1987 = vmatpush3.bf16.msra.mxu1 %v2265_v15 }
  0xb9   : > { %1988 = vmatprep.subr.bf16.mxu1 %v2553_v6 }
  0xba   : > { %2003 = vmatpush3.bf16.msra.mxu0 %v2280_v26 }
  0xbb   : > { %2004 = vmatprep.subr.bf16.mxu0 %v2553_v6 }
  0xbc   : > { %1989 = vmatpush3.bf16.msra.mxu1 %v2269_v16 }
  0xbd   : > { %2014 = vmatprep.subr.bf16.mxu1 %v2553_v6 }
  0xbe   : > { %2005 = vmatpush3.bf16.msra.mxu0 %v2281_v27 }
  0xbf   : > { %1991 = vmatmul.mubr.bf16.vlgmr.msra.gmra.mrb[8].mxu1 %v560_v17  ;;  %2006 = vmatprep.subr.bf16.mxu0 %v2553_v6  ;;  %v2298_v17 = vld [vmem:[#allocation8 + $0xf0] sm:$0xff]  }
  0xc0   : > { %2030 = vmatprep.mubr.msk.bf16.mxu1 %vm2554_vm1, %v2553_v6  ;;  %2015 = vmatpush3.bf16.msra.mxu1 %v2284_v30 }
  0xc1   : > { %2016 = vmatprep.subr.bf16.mxu1 %v2553_v6 }
  0xc2   : > { %2007 = vmatpush3.bf16.msra.mxu0 %v2282_v28 }
  0xc3   : > { %2008 = vmatprep.subr.bf16.mxu0 %v2553_v6 }
  0xc4   : > { %2017 = vmatpush3.bf16.msra.mxu1 %v2285_v31 }
  0xc5   : > { %2018 = vmatprep.subr.bf16.mxu1 %v2553_v6 }
  0xc6   : > { %2009 = vmatpush3.bf16.msra.mxu0 %v2283_v29 }
  0xc7   : > { %2034 = vmatprep.subr.bf16.mxu0 %v2553_v6 }
  0xc8   : > { %2019 = vmatpush3.bf16.msra.mxu1 %v2286_v32  ;;  %v2306_v32 = vld [vmem:[#allocation8 + $0x130] sm:$0xff]  }
  0xc9   : > { %2020 = vmatprep.subr.bf16.mxu1 %v2553_v6 }
  0xcc   : > { %2021 = vmatpush3.bf16.msra.mxu1 %v2287_v33  ;;  %v2307_v33 = vld [vmem:[#allocation8 + $0x138] sm:$0xff]  }
  0xcd   : > { %2022 = vmatprep.subr.bf16.mxu1 %v2553_v6 }
  0xd0   : > { %2023 = vmatpush3.bf16.msra.mxu1 %v2288_v34  ;;  %v2308_v34 = vld [vmem:[#allocation8 + $0x140] sm:$0xff]  }
  0xd1   : > { %2024 = vmatprep.subr.bf16.mxu1 %v2553_v6 }
  0xd4   : > { %2025 = vmatpush3.bf16.msra.mxu1 %v2289_v35  ;;  %v2309_v35 = vld [vmem:[#allocation8 + $0x148] sm:$0xff]  }
  0xd5   : > { %2026 = vmatprep.subr.bf16.mxu1 %v2553_v6 }
  0xd8   : > { %2027 = vmatpush3.bf16.msra.mxu1 %v2290_v0 }
  0xd9   : > { %2028 = vmatprep.subr.bf16.mxu1 %v2553_v6 }
  0xdc   : > { %2029 = vmatpush3.bf16.msra.mxu1 %v2291_v1 }
  0xdd   : > { %2054 = vmatprep.subr.bf16.mxu1 %v2553_v6 }
 0x16a   : > { %v2840_v36 = vpop.f32.mrb[0].mxu1 }
 0x16b   : > { %v2842_v37 = vpop.f32.mrb[1].mxu1 }
 0x16c   : > { %v424_v38 = vpop.f32.mrb[2].mxu1  ;;  %v379_v43 = vpop.f32.mrb[0].mxu0 }
 0x16d   : > { %v425_v39 = vpop.f32.mrb[3].mxu1  ;;  %v381_v45 = vpop.f32.mrb[1].mxu0  ;;  %v2311_v38 = vld [vmem:[#allocation8 + $0x158] sm:$0xff]  }
 0x16e   : > { %v383_v46 = vpop.f32.mrb[2].mxu0  ;;  %v2312_v39 = vld [vmem:[#allocation8 + $0x160] sm:$0xff]  }
 0x16f   : > { %v384_v47 = vpop.f32.mrb[3].mxu0 }
 0x172   : > { %v2844_v40 = vpop.f32.mrb[4].mxu1 }
 0x173   : > { %v2846_v41 = vpop.f32.mrb[5].mxu1 }
 0x174   : > { %v506_v42 = vpop.f32.mrb[6].mxu1  ;;  %v2854_v56 = vpop.f32.mrb[4].mxu0 }
 0x175   : > { %v507_v44 = vpop.f32.mrb[7].mxu1  ;;  %v2856_v57 = vpop.f32.mrb[5].mxu0  ;;  %v2313_v42 = vld [vmem:[#allocation8 + $0x168] sm:$0xff]  }
 0x176   : > { %v465_v58 = vpop.f32.mrb[6].mxu0 }
 0x177   : > { %v466_v59 = vpop.f32.mrb[7].mxu0  ;;  %v2320_v58 = vld [vmem:[#allocation8 + $0x1a0] sm:$0xff]  }
 0x178   : > { %v2321_v59 = vld [vmem:[#allocation8 + $0x1a8] sm:$0xff]  }
 0x17c   : > { %v2858_v60 = vpop.f32.mrb[8].mxu0 }
 0x17d   : > { %v2860_v61 = vpop.f32.mrb[9].mxu0 }
 0x17e   : > { %v547_v62 = vpop.f32.mrb[10].mxu0 }
 0x17f   : > { %v548_v63 = vpop.f32.mrb[11].mxu0 }
 0x192   : > { %v660_v48 = vpop.f32.mrb[8].mxu1 }
 0x193   : > { %v661_v49 = vadd.f32 %v660_v48, %v379_v43  ;;  %v1992_v50 = vpop.f32.mrb[9].mxu1 }
 0x194   : > { %v663_v51 = vpop.f32.mrb[10].mxu1 }
 0x195   : > { %v666_v52 = vmul.f32 0.01, %v661_v49  ;;  %v1993_v53 = vpop.f32.mrb[11].mxu1  ;;  %v2314_v51 = vld [vmem:[#allocation8 + $0x170] sm:$0xff]  }
 0x196   : > { %v2316_v53 = vld [vmem:[#allocation8 + $0x180] sm:$0xff]  }
 0x197   : > { %v2848_v54 = vmax.f32 %v661_v49, %v666_v52  ;;  %v2315_v52 = vld [vmem:[#allocation8 + $0x178] sm:$0xff]  }
 0x199   : > { %v685_v55 = vpack.c.bf16 %v2848_v54, %v2848_v54 }
 0x19b   : > { %2011 = vmatmul.mubr.bf16.vlgmr.msra.gmra.mrb[12].mxu0 %v685_v55  ;;  %v2319_v55 = vld [vmem:[#allocation8 + $0x198] sm:$0xff]  }
 0x19c   : > { %2050 = vmatprep.mubr.msk.bf16.mxu0 %vm2554_vm1, %v2553_v6  ;;  %2035 = vmatpush3.bf16.msra.mxu0 %v2292_v2 }
 0x19d   : > { %2036 = vmatprep.subr.bf16.mxu0 %v2553_v6 }
 0x1a0   : > { %2037 = vmatpush3.bf16.msra.mxu0 %v2293_v3 }
 0x1a1   : > { %2038 = vmatprep.subr.bf16.mxu0 %v2553_v6 }
 0x1a4   : > { %2039 = vmatpush3.bf16.msra.mxu0 %v2294_v4 }
 0x1a5   : > { %2040 = vmatprep.subr.bf16.mxu0 %v2553_v6 }
 0x1a8   : > { %2041 = vmatpush3.bf16.msra.mxu0 %v2295_v5  ;;  %v2322_v5 = vld [vmem:[#allocation8 + $0x1b0] sm:$0xff]  }
 0x1a9   : > { %2042 = vmatprep.subr.bf16.mxu0 %v2553_v6 }
 0x1ac   : > { %2043 = vmatpush3.bf16.msra.mxu0 %v2296_v7  ;;  %v2323_v7 = vld [vmem:[#allocation8 + $0x1b8] sm:$0xff]  }
 0x1ad   : > { %2044 = vmatprep.subr.bf16.mxu0 %v2553_v6 }
 0x1b0   : > { %2045 = vmatpush3.bf16.msra.mxu0 %v2297_v8  ;;  %v2325_v8 = vld [vmem:[#allocation8 + $0x1c8] sm:$0xff]  }
 0x1b1   : > { %2046 = vmatprep.subr.bf16.mxu0 %v2553_v6 }
 0x1b4   : > { %2047 = vmatpush3.bf16.msra.mxu0 %v2298_v17 }
 0x1b5   : > { %2048 = vmatprep.subr.bf16.mxu0 %v2553_v6 }
 0x1b8   : > { %2049 = vmatpush3.bf16.msra.mxu0 %v2299_v18 }
 0x1b9   : > { %2074 = vmatprep.subr.bf16.mxu0 %v2553_v6 }
 0x26e   : > { %v769_v9 = vpop.f32.mrb[12].mxu0 }
 0x26f   : > { %v770_v10 = vadd.f32 %v769_v9, %v381_v45  ;;  %v2012_v11 = vpop.f32.mrb[13].mxu0  ;;  %v2326_v9 = vld [vmem:[#allocation8 + $0x1d0] sm:$0xff]  }
 0x270   : > { %v772_v12 = vpop.f32.mrb[14].mxu0  ;;  %v2328_v11 = vld [vmem:[#allocation8 + $0x1e0] sm:$0xff]  }
 0x271   : > { %v775_v13 = vmul.f32 0.01, %v770_v10  ;;  %v2013_v14 = vpop.f32.mrb[15].mxu0  ;;  %v2329_v12 = vld [vmem:[#allocation8 + $0x1e8] sm:$0xff]  }
 0x273   : > { %v776_v15 = vmax.f32 %v770_v10, %v775_v13  ;;  %v2327_v10 = vld [vmem:[#allocation8 + $0x1d8] sm:$0xff]  }
 0x275   : > { %v794_v16 = vpack.c.bf16 %v776_v15, %v776_v15 }
 0x277   : > { %2031 = vmatmul.mubr.bf16.vlgmr.msra.gmra.mrb[12].mxu1 %v794_v16 }
 0x278   : > { %2070 = vmatprep.mubr.msk.bf16.mxu1 %vm2554_vm1, %v2553_v6  ;;  %2055 = vmatpush3.bf16.msra.mxu1 %v2300_v19 }
 0x279   : > { %2056 = vmatprep.subr.bf16.mxu1 %v2553_v6 }
 0x27c   : > { %2057 = vmatpush3.bf16.msra.mxu1 %v2301_v20 }
 0x27d   : > { %2058 = vmatprep.subr.bf16.mxu1 %v2553_v6 }
 0x280   : > { %2059 = vmatpush3.bf16.msra.mxu1 %v2302_v21  ;;  %v2330_v21 = vld [vmem:[#allocation8 + $0x1f0] sm:$0xff]  }
 0x281   : > { %2060 = vmatprep.subr.bf16.mxu1 %v2553_v6 }
 0x284   : > { %2061 = vmatpush3.bf16.msra.mxu1 %v2303_v22  ;;  %v2331_v22 = vld [vmem:[#allocation8 + $0x1f8] sm:$0xff]  }
 0x285   : > { %2062 = vmatprep.subr.bf16.mxu1 %v2553_v6 }
 0x288   : > { %2063 = vmatpush3.bf16.msra.mxu1 %v2304_v23  ;;  %v2332_v23 = vld [vmem:[#allocation8 + $0x200] sm:$0xff]  }
 0x289   : > { %2064 = vmatprep.subr.bf16.mxu1 %v2553_v6 }
 0x28c   : > { %2065 = vmatpush3.bf16.msra.mxu1 %v2305_v24  ;;  %v2334_v24 = vld [vmem:[#allocation8 + $0x210] sm:$0xff]  }
 0x28d   : > { %2066 = vmatprep.subr.bf16.mxu1 %v2553_v6 }
 0x290   : > { %2067 = vmatpush3.bf16.msra.mxu1 %v2306_v32 }
 0x291   : > { %2068 = vmatprep.subr.bf16.mxu1 %v2553_v6 }
 0x294   : > { %2069 = vmatpush3.bf16.msra.mxu1 %v2307_v33 }
 0x295   : > { %2094 = vmatprep.subr.bf16.mxu1 %v2553_v6 }
 0x34a   : > { %v878_v25 = vpop.f32.mrb[12].mxu1 }
 0x34b   : > { %v879_v26 = vadd.f32 %v878_v25, %v2840_v36  ;;  %v2032_v27 = vpop.f32.mrb[13].mxu1  ;;  %v2310_v36 = vld [vmem:[#allocation8 + $0x150] sm:$0xff]   ;;  %v2335_v25 = vld [vmem:[#allocation8 + $0x218] sm:$0xff]  }
 0x34c   : > { %v881_v28 = vpop.f32.mrb[14].mxu1  ;;  %v2337_v27 = vld [vmem:[#allocation8 + $0x228] sm:$0xff]  }
 0x34d   : > { %v2882_v29 = vadd.f32 %v879_v26, %v2848_v54  ;;  %v2033_v30 = vpop.f32.mrb[15].mxu1  ;;  %v2318_v54 = vld [vmem:[#allocation8 + $0x190] sm:$0xff]   ;;  %v2336_v26 = vld [vmem:[#allocation8 + $0x220] sm:$0xff]  }
 0x34f   : > { %v902_v31 = vpack.c.bf16 %v2882_v29, %v2882_v29 }
 0x351   : > { %2051 = vmatmul.mubr.bf16.vlgmr.msra.gmra.mrb[16].mxu0 %v902_v31 }
 0x352   : > { %2090 = vmatprep.mubr.msk.bf16.mxu0 %vm2554_vm1, %v2553_v6  ;;  %2075 = vmatpush3.bf16.msra.mxu0 %v2308_v34 }
 0x353   : > { %2076 = vmatprep.subr.bf16.mxu0 %v2553_v6 }
 0x356   : > { %2077 = vmatpush3.bf16.msra.mxu0 %v2309_v35  ;;  %v2338_v35 = vld [vmem:[#allocation8 + $0x230] sm:$0xff]  }
 0x357   : > { %2078 = vmatprep.subr.bf16.mxu0 %v2553_v6 }
 0x35a   : > { %2079 = vmatpush3.bf16.msra.mxu0 %v2310_v36  ;;  %v2339_v36 = vld [vmem:[#allocation8 + $0x238] sm:$0xff]  }
 0x35b   : > { %2080 = vmatprep.subr.bf16.mxu0 %v2553_v6 }
 0x35e   : > { %2081 = vmatpush3.bf16.msra.mxu0 %v2311_v38  ;;  %v2340_v38 = vld [vmem:[#allocation8 + $0x240] sm:$0xff]  }
 0x35f   : > { %2082 = vmatprep.subr.bf16.mxu0 %v2553_v6 }
 0x362   : > { %2083 = vmatpush3.bf16.msra.mxu0 %v2312_v39  ;;  %v2341_v39 = vld [vmem:[#allocation8 + $0x248] sm:$0xff]  }
 0x363   : > { %2084 = vmatprep.subr.bf16.mxu0 %v2553_v6 }
 0x366   : > { %2085 = vmatpush3.bf16.msra.mxu0 %v2313_v42  ;;  %v2343_v42 = vld [vmem:[#allocation8 + $0x258] sm:$0xff]  }
 0x367   : > { %2086 = vmatprep.subr.bf16.mxu0 %v2553_v6 }
 0x36a   : > { %2087 = vmatpush3.bf16.msra.mxu0 %v2314_v51 }
 0x36b   : > { %2088 = vmatprep.subr.bf16.mxu0 %v2553_v6 }
 0x36e   : > { %2089 = vmatpush3.bf16.msra.mxu0 %v2315_v52 }
 0x36f   : > { %2114 = vmatprep.subr.bf16.mxu0 %v2553_v6 }
 0x424   : > { %v986_v43 = vpop.f32.mrb[16].mxu0 }
 0x425   : > { %v987_v44 = vadd.f32 %v986_v43, %v2842_v37  ;;  %v2052_v45 = vpop.f32.mrb[17].mxu0  ;;  %v2317_v37 = vld [vmem:[#allocation8 + $0x188] sm:$0xff]   ;;  %v2344_v43 = vld [vmem:[#allocation8 + $0x260] sm:$0xff]  }
 0x426   : > { %v989_v46 = vpop.f32.mrb[18].mxu0 }
 0x427   : > { %v992_v47 = vmul.f32 0.01, %v987_v44  ;;  %v2053_v48 = vpop.f32.mrb[19].mxu0 }
 0x429   : > { %v993_v49 = vmax.f32 %v987_v44, %v992_v47  ;;  %v2345_v44 = vld [vmem:[#allocation8 + $0x268] sm:$0xff]  }
 0x42b   : > { %v1011_v50 = vpack.c.bf16 %v993_v49, %v993_v49 }
 0x42d   : > { %2071 = vmatmul.mubr.bf16.vlgmr.msra.gmra.mrb[16].mxu1 %v1011_v50 }
 0x42e   : > { %2110 = vmatprep.mubr.msk.bf16.mxu1 %vm2554_vm1, %v2553_v6  ;;  %2095 = vmatpush3.bf16.msra.mxu1 %v2316_v53  ;;  %v2346_v53 = vld [vmem:[#allocation8 + $0x270] sm:$0xff]  }
 0x42f   : > { %2096 = vmatprep.subr.bf16.mxu1 %v2553_v6 }
 0x432   : > { %2097 = vmatpush3.bf16.msra.mxu1 %v2317_v37  ;;  %v2347_v37 = vld [vmem:[#allocation8 + $0x278] sm:$0xff]  }
 0x433   : > { %2098 = vmatprep.subr.bf16.mxu1 %v2553_v6 }
 0x436   : > { %2099 = vmatpush3.bf16.msra.mxu1 %v2318_v54 }
 0x437   : > { %2100 = vmatprep.subr.bf16.mxu1 %v2553_v6 }
 0x43a   : > { %2101 = vmatpush3.bf16.msra.mxu1 %v2319_v55 }
 0x43b   : > { %2102 = vmatprep.subr.bf16.mxu1 %v2553_v6 }
 0x43e   : > { %2103 = vmatpush3.bf16.msra.mxu1 %v2320_v58 }
 0x43f   : > { %2104 = vmatprep.subr.bf16.mxu1 %v2553_v6 }
 0x442   : > { %2105 = vmatpush3.bf16.msra.mxu1 %v2321_v59 }
 0x443   : > { %2106 = vmatprep.subr.bf16.mxu1 %v2553_v6 }
 0x446   : > { %2107 = vmatpush3.bf16.msra.mxu1 %v2322_v5 }
 0x447   : > { %2108 = vmatprep.subr.bf16.mxu1 %v2553_v6 }
 0x44a   : > { %2109 = vmatpush3.bf16.msra.mxu1 %v2323_v7 }
 0x44b   : > { %2134 = vmatprep.subr.bf16.mxu1 %v2553_v6 }
 0x500   : > { %v1095_v62 = vpop.f32.mrb[16].mxu1 }
 0x501   : > { %v1096_v63 = vadd.f32 %v1095_v62, %v2854_v56  ;;  %v2072_v0 = vpop.f32.mrb[17].mxu1  ;;  %v2324_v56 = vld [vmem:[#allocation8 + $0x1c0] sm:$0xff]  }
 0x502   : > { %v1098_v1 = vpop.f32.mrb[18].mxu1 }
 0x503   : > { %v2909_v2 = vadd.f32 %v1096_v63, %v2882_v29  ;;  %v2073_v3 = vpop.f32.mrb[19].mxu1 }
 0x505   : > { %v1119_v4 = vpack.c.bf16 %v2909_v2, %v2909_v2 }
 0x507   : > { %2091 = vmatmul.mubr.bf16.vlgmr.msra.gmra.mrb[20].mxu0 %v1119_v4 }
 0x508   : > { %2130 = vmatprep.mubr.msk.bf16.mxu0 %vm2554_vm1, %v2553_v6  ;;  %2115 = vmatpush3.bf16.msra.mxu0 %v2324_v56 }
 0x509   : > { %2116 = vmatprep.subr.bf16.mxu0 %v2553_v6 }
 0x50c   : > { %2117 = vmatpush3.bf16.msra.mxu0 %v2325_v8 }
 0x50d   : > { %2118 = vmatprep.subr.bf16.mxu0 %v2553_v6 }
 0x510   : > { %2119 = vmatpush3.bf16.msra.mxu0 %v2326_v9 }
 0x511   : > { %2120 = vmatprep.subr.bf16.mxu0 %v2553_v6 }
 0x514   : > { %2121 = vmatpush3.bf16.msra.mxu0 %v2327_v10 }
 0x515   : > { %2122 = vmatprep.subr.bf16.mxu0 %v2553_v6 }
 0x518   : > { %2123 = vmatpush3.bf16.msra.mxu0 %v2328_v11 }
 0x519   : > { %2124 = vmatprep.subr.bf16.mxu0 %v2553_v6 }
 0x51c   : > { %2125 = vmatpush3.bf16.msra.mxu0 %v2329_v12 }
 0x51d   : > { %2126 = vmatprep.subr.bf16.mxu0 %v2553_v6 }
 0x520   : > { %2127 = vmatpush3.bf16.msra.mxu0 %v2330_v21 }
 0x521   : > { %2128 = vmatprep.subr.bf16.mxu0 %v2553_v6 }
 0x524   : > { %2129 = vmatpush3.bf16.msra.mxu0 %v2331_v22 }
 0x525   : > { %2154 = vmatprep.subr.bf16.mxu0 %v2553_v6 }
 0x5da   : > { %v1203_v13 = vpop.f32.mrb[20].mxu0 }
 0x5db   : > { %v1204_v14 = vadd.f32 %v1203_v13, %v2856_v57  ;;  %v2092_v15 = vpop.f32.mrb[21].mxu0  ;;  %v2333_v57 = vld [vmem:[#allocation8 + $0x208] sm:$0xff]  }
 0x5dc   : > { %v1206_v16 = vpop.f32.mrb[22].mxu0 }
 0x5dd   : > { %v1209_v17 = vmul.f32 0.01, %v1204_v14  ;;  %v2093_v18 = vpop.f32.mrb[23].mxu0 }
 0x5df   : > { %v1210_v19 = vmax.f32 %v1204_v14, %v1209_v17 }
 0x5e1   : > { %v1228_v20 = vpack.c.bf16 %v1210_v19, %v1210_v19 }
 0x5e3   : > { %2111 = vmatmul.mubr.bf16.vlgmr.msra.gmra.mrb[20].mxu1 %v1228_v20 }
 0x5e4   : > { %2150 = vmatprep.mubr.msk.bf16.mxu1 %vm2554_vm1, %v2553_v6  ;;  %2135 = vmatpush3.bf16.msra.mxu1 %v2332_v23 }
 0x5e5   : > { %2136 = vmatprep.subr.bf16.mxu1 %v2553_v6 }
 0x5e8   : > { %2137 = vmatpush3.bf16.msra.mxu1 %v2333_v57 }
 0x5e9   : > { %2138 = vmatprep.subr.bf16.mxu1 %v2553_v6 }
 0x5ec   : > { %2139 = vmatpush3.bf16.msra.mxu1 %v2334_v24 }
 0x5ed   : > { %2140 = vmatprep.subr.bf16.mxu1 %v2553_v6 }
 0x5f0   : > { %2141 = vmatpush3.bf16.msra.mxu1 %v2335_v25 }
 0x5f1   : > { %2142 = vmatprep.subr.bf16.mxu1 %v2553_v6 }
 0x5f4   : > { %2143 = vmatpush3.bf16.msra.mxu1 %v2336_v26 }
 0x5f5   : > { %2144 = vmatprep.subr.bf16.mxu1 %v2553_v6 }
 0x5f8   : > { %2145 = vmatpush3.bf16.msra.mxu1 %v2337_v27 }
 0x5f9   : > { %2146 = vmatprep.subr.bf16.mxu1 %v2553_v6 }
 0x5fc   : > { %2147 = vmatpush3.bf16.msra.mxu1 %v2338_v35 }
 0x5fd   : > { %2148 = vmatprep.subr.bf16.mxu1 %v2553_v6 }
 0x600   : > { %2149 = vmatpush3.bf16.msra.mxu1 %v2339_v36 }
 0x6b6   : > { %v1312_v28 = vpop.f32.mrb[20].mxu1 }
 0x6b7   : > { %v1313_v29 = vadd.f32 %v1312_v28, %v2844_v40  ;;  %v2112_v30 = vpop.f32.mrb[21].mxu1  ;;  %v2342_v40 = vld [vmem:[#allocation8 + $0x250] sm:$0xff]  }
 0x6b8   : > { %v1315_v31 = vpop.f32.mrb[22].mxu1 }
 0x6b9   : > { %v1318_v32 = vadd.f32 %v1313_v29, %v2909_v2  ;;  %v2113_v33 = vpop.f32.mrb[23].mxu1 }
 0x6bb   : > { %v1336_v34 = vpack.c.bf16 %v1318_v32, %v1318_v32 }
 0x6bd   : > { %2131 = vmatmul.mubr.bf16.vlgmr.msra.gmra.mrb[24].mxu0 %v1336_v34 }
 0x6be   : > { %2170 = vmatprep.mubr.msk.bf16.mxu0 %vm2554_vm1, %v2553_v6  ;;  %2155 = vmatpush3.bf16.msra.mxu0 %v2340_v38 }
 0x6bf   : > { %2156 = vmatprep.subr.bf16.mxu0 %v2553_v6 }
 0x6c2   : > { %2157 = vmatpush3.bf16.msra.mxu0 %v2341_v39 }
 0x6c3   : > { %2158 = vmatprep.subr.bf16.mxu0 %v2553_v6 }
 0x6c6   : > { %2159 = vmatpush3.bf16.msra.mxu0 %v2342_v40 }
 0x6c7   : > { %2160 = vmatprep.subr.bf16.mxu0 %v2553_v6 }
 0x6ca   : > { %2161 = vmatpush3.bf16.msra.mxu0 %v2343_v42 }
 0x6cb   : > { %2162 = vmatprep.subr.bf16.mxu0 %v2553_v6 }
 0x6ce   : > { %2163 = vmatpush3.bf16.msra.mxu0 %v2344_v43 }
 0x6cf   : > { %2164 = vmatprep.subr.bf16.mxu0 %v2553_v6 }
 0x6d2   : > { %2165 = vmatpush3.bf16.msra.mxu0 %v2345_v44 }
 0x6d3   : > { %2166 = vmatprep.subr.bf16.mxu0 %v2553_v6 }
 0x6d6   : > { %2167 = vmatpush3.bf16.msra.mxu0 %v2346_v53 }
 0x6d7   : > { %2168 = vmatprep.subr.bf16.mxu0 %v2553_v6 }
 0x6da   : > { %2169 = vmatpush3.bf16.msra.mxu0 %v2347_v37 }
 0x790   : > { %v1420_v45 = vpop.f32.mrb[24].mxu0 }
 0x791   : > { %v1421_v46 = vadd.f32 %v1420_v45, %v2846_v41  ;;  %v2132_v47 = vpop.f32.mrb[25].mxu0 }
 0x792   : > { %v1423_v48 = vpop.f32.mrb[26].mxu0 }
 0x793   : > { %v1426_v49 = vmul.f32 0.01, %v1421_v46  ;;  %v2133_v50 = vpop.f32.mrb[27].mxu0 }
 0x795   : > { %v1427_v51 = vmax.f32 %v1421_v46, %v1426_v49 }
 0x797   : > { %v1445_v52 = vpack.c.bf16 %v1427_v51, %v1427_v51 }
 0x799   : > { %2151 = vmatmul.mubr.bf16.vlgmr.msra.gmra.mrb[24].mxu1 %v1445_v52 }
 0x86c   : > { %v1529_v54 = vpop.f32.mrb[24].mxu1 }
 0x86d   : > { %v1530_v55 = vadd.f32 %v1529_v54, %v2858_v60  ;;  %v2152_v58 = vpop.f32.mrb[25].mxu1 }
 0x86e   : > { %v1532_v41 = vpop.f32.mrb[26].mxu1 }
 0x86f   : > { %v1535_v59 = vadd.f32 %v1530_v55, %v1318_v32  ;;  %v2153_v62 = vpop.f32.mrb[27].mxu1 }
 0x871   : > { %v1553_v63 = vpack.c.bf16 %v1535_v59, %v1535_v59 }
 0x873   : > { %2171 = vmatmul.mubr.bf16.vlgmr.msra.gmra.mrb[28].mxu0 %v1553_v63 }
 0x946   : > { %v1637_v0 = vpop.f32.mrb[28].mxu0 }
 0x947   : > { %v1638_v6 = vadd.f32 %v1637_v0, %v2860_v61  ;;  %v2172_v1 = vpop.f32.mrb[29].mxu0 }
 0x948   : > { %v1640_v60 = vpop.f32.mrb[30].mxu0 }
 0x949   : > { %1643 = vst [vmem:[%s278_s29] sm:$0xff] %v1638_v6  ;;  %v2173_v2 = vpop.f32.mrb[31].mxu0 }
 0x94a   : > { %2477 = shalt.err (!%p2474_p5)
}
 0x94b   : > { %s2478_s12 = scalar_lea.hbm %s2954_s2, 128  ;;  %s2482_s7 = scalar_lea.hbm %s3002_s4, 256 }
 0x94c   : > { %p2479_p1 = scmp.ne.s32.totalorder %s2954_s2, %s2478_s12  ;;  %p2483_p0 = scmp.lt.u32.totalorder %s2954_s2, %s3002_s4 }
 0x94d   : > { %p2484_p9 = scmp.lt.u32.totalorder %s2482_s7, %s2478_s12  ;;  %p2486_p2 = scmp.lt.u32.totalorder %s2478_s12, %s2954_s2 }
 0x94e   : > { %p2480_p8 = pnand %p2479_p1, %p3022_p13 }
 0x94f   : > { %p2485_p12 = por %p2484_p9, %p2483_p0 }
 0x950   : > { %p2481_p11 = pneg %p2480_p8 }
 0x951   : > { %p2487_p6 = por %p2486_p2, %p2485_p12 }
 0x953   : > { %p2488_p10 = pnand %p2487_p6, %p2481_p11 }
 0x955   : > { %2491 = shalt.err (!%p2488_p10)
}
 0x956   : > { %2186 = dma.vmem_to_hbm [thread:$0]  (%p3022_p13), %s2956_s26, 128, %s2954_s2, %s1645_s19  }
 0x957 PF: > { %s1670_s9 = sand.u32 1, %s2530_s15   ;;  %p3023_p4 = scmp.ne.s32.totalorder %s3009_s22, 0 }
 0x958   : > { %p3024_p7 = scmp.ge.s32.totalorder %s2542_s18, 2  ;;  %s1671_s21 = scalar_lea.sflag [#allocation5], %s1670_s9 }
 0x95a   : > { %p2203_p3 = pnand %p3024_p7, %p3023_p4 }
 0x95c   : > { %2525 = dma.done.wait (!%p2203_p3), %s1671_s21, 128  }
 0x95d   : > { %2527 = vsyncadd (!%p2203_p3), %s1671_s21, 4294967168  ;;  %p21_p5 = scmp.ge.s32.totalorder %s2691_s11, 4   ;;  %s3025_s15 = smov %s2534_s16 }
 0x95e   : > { %s3026_s16 = smov %s2538_s17  ;;  %s3027_s17 = smov %s2700_s14 }
 0x95f   : > { %s3028_s18 = smov %s2691_s11  ;;  %23 = sbr.rel (!%p21_p5) target bundleno = 10 (0xa), region = 111 }
 0x966   :  { %1676 = vsyncpa [#allocation4], 1 }
 0x967   :  { %1678 = vsyncpa [#allocation4 + $0x1], 1 }
 0x968   :  { %1679 = vsyncpa [#allocation7], 1 }
 0x969   :  { %1681 = vsyncpa [#allocation7 + $0x1], 1 }
 0x96a   :  { %1682 = vsyncpa [#allocation10], 1 }
 0x96b   :  { %1683 = vsyncpa [#allocation5], 1 }
 0x96c   :  { %1685 = vsyncpa [#allocation5 + $0x1], 1 }

// kernel: tpu_custom_call.1
= control target key start
LH: loop header
LB: loop body
LE: loop exit
PB: predicated region body
PF: predicated region fallthrough
CT: control target
= control target key end

     0   :  { %s2998_s0 = inlined_call_operand.hbm [shape: bf16[16,128], index: 0, kind: input, shape index: {}]   ;;  %s2999_s1 = inlined_call_operand.hbm [shape: bf16[16,16], index: 1, kind: input, shape index: {}]   ;;  %s3000_s2 = inlined_call_operand.hbm [shape: bf16[10,128,128], index: 2, kind: input, shape index: {}]   ;;  %s3001_s3 = inlined_call_operand.hbm [shape: bf16[16,1280], index: 3, kind: input, shape index: {}]   ;;  %s3002_s4 = inlined_call_operand.hbm [shape: f32[16,128], index: 4, kind: output, shape index: {}]  }
   0x1   :  { %3007 = sst [smem:[#allocation17_spill]] %s3000_s2 }
   0x2   :  { %9 = vsyncpa [#allocation4], 0 }
   0x3   :  { %11 = vsyncpa [#allocation4 + $0x1], 0 }
   0x4   :  { %12 = vsyncpa [#allocation7], 0 }
   0x5   :  { %14 = vsyncpa [#allocation7 + $0x1], 0 }
   0x6   :  { %15 = vsyncpa [#allocation10], 0 }
   0x7   :  { %16 = vsyncpa [#allocation5], 0 }
   0x8   :  { %18 = vsyncpa [#allocation5 + $0x1], 0  ;;  %s2581_s15 = smov 0   ;;  %s2583_s16 = smov 0  }
   0x9   :  { %s2585_s17 = smov 0   ;;  %s2587_s18 = smov 0  }
   0xa LB: > { %s2602_s19 = sadd.s32 4294967295, %s2542_s18   ;;  %s1770_s20 = sadd.s32 4294967294, %s2542_s18   ;;  %s2542_s18 = sphi %s2587_s18, %s3028_s18   ;;  %s2538_s17 = sphi %s2585_s17, %s3027_s17   ;;  %s2534_s16 = sphi %s2583_s16, %s3026_s16   ;;  %s2530_s15 = sphi %s2581_s15, %s3025_s15  }
   0xb   : > { %p44_p0 = scmp.ne.s32.totalorder %s2534_s16, %s2530_s15  ;;  %p3003_p1 = scmp.eq.s32.totalorder %s2602_s19, 0 }
   0xc   : > { %p142_p3 = scmp.eq.s32.totalorder %s1770_s20, 1  ;;  %p1771_p5 = scmp.ge.s32.totalorder %s2542_s18, 1 }
   0xd   : > { %p2611_p4 = por %p3003_p1, %p44_p0  ;;  %p149_p7 = scmp.lt.s32.totalorder %s2542_s18, 3 }
   0xe   : > { %p2616_p6 = por %p142_p3, %p44_p0  ;;  %s2544_s24 = smov [#allocation8]  }
   0xf   : > { %s3008_s21 = scalar_select %p2611_p4, 1, 0 }
  0x10   : > { %s3009_s22 = scalar_select %p2616_p6, 1, 0 }
  0x11   : > { %p2621_p8 = pnand %p1771_p5, %p149_p7  ;;  %s161_s25 = sshll.u32 %s2544_s24, 4  ;;  %s2625_s25 = int_to_ptr.vmem [resolvable:$true] %s161_s25 }
  0x12   : > { %s2545_s27 = smov [#allocation9]   ;;  %s3012_s2 = sld [smem:[#allocation17_spill]] }
  0x13   : > { %s3010_s23 = scalar_select %p2621_p8, 1, 0 }
  0x14   : > { %p2188_p9 = pneg %p2621_p8  ;;  %s174_s28 = sshll.u32 %s2545_s27, 4  ;;  %s2636_s28 = int_to_ptr.vmem [resolvable:$true] %s174_s28 }
  0x16   : > { %p2632_p11 = pnand %p2188_p9, %p3003_p1 }
  0x18   : > { %s2348_s5 = scalar_lea.hbm %s3012_s2, 10240  ;;  %p2350_p13 = pneg %p2632_p11 }
  0x19   : > { %p2349_p12 = scmp.ne.s32.totalorder %s3012_s2, %s2348_s5  ;;  %p2355_p5 = scmp.lt.u32.totalorder %s2348_s5, %s3012_s2 }
  0x1b   : > { %p2351_p0 = pnand %p2350_p13, %p2349_p12 }
  0x1d   : > { %p2352_p3 = pneg %p2351_p0 }
  0x1f   : > { %p2357_p7 = pnand %p2355_p5, %p2352_p3 }
  0x21   : > { %2360 = shalt.err (!%p2357_p7)
}
  0x22   : > { %s2361_s10 = scalar_lea.vmem %s2625_s25, 10240  ;;  %p2369_p2 = scmp.lt.s32.totalorder %s2625_s25, %s2625_s25 }
  0x23   : > { %p2362_p9 = scmp.ne.s32.totalorder %s2625_s25, %s2361_s10  ;;  %p2370_p12 = scmp.lt.s32.totalorder %s2361_s10, %s2361_s10 }
  0x25   : > { %p2364_p10 = pnand %p2362_p9, %p2350_p13  ;;  %p2371_p0 = por %p2370_p12, %p2369_p2 }
  0x27   : > { %p2365_p1 = pneg %p2364_p10 }
  0x29   : > { %p2372_p6 = pnand %p2371_p0, %p2365_p1 }
  0x2b   : > { %2375 = shalt.err (!%p2372_p6)
}
  0x2c   : > { %s2546_s11 = smov 64   ;;  %s2547_s12 = smov 4  }
  0x2d   : > { %2191 = dma.hbm_to_vmem [thread:$0]  (!%p2632_p11), %s3012_s2, 10240, %s2625_s25, [#allocation7], %s2546_s11, %s2546_s11, %s2547_s12  }
  0x2e   : > { %s2376_s27 = scalar_lea.hbm %s3001_s3, 1280 }
  0x2f   : > { %p2377_p2 = scmp.ne.s32.totalorder %s3001_s3, %s2376_s27  ;;  %p2383_p10 = scmp.lt.u32.totalorder %s2376_s27, %s3001_s3 }
  0x31   : > { %p2379_p1 = pnand %p2377_p2, %p2350_p13 }
  0x33   : > { %p2380_p6 = pneg %p2379_p1 }
  0x35   : > { %p2385_p3 = pnand %p2383_p10, %p2380_p6 }
  0x37   : > { %2388 = shalt.err (!%p2385_p3)
}
  0x38   : > { %s2389_s25 = scalar_lea.vmem %s2636_s28, 1280  ;;  %p2397_p12 = scmp.lt.s32.totalorder %s2636_s28, %s2636_s28 }
  0x39   : > { %p2390_p5 = scmp.ne.s32.totalorder %s2636_s28, %s2389_s25  ;;  %p2398_p0 = scmp.lt.s32.totalorder %s2389_s25, %s2389_s25 }
  0x3b   : > { %p2392_p7 = pnand %p2390_p5, %p2350_p13  ;;  %p2399_p2 = por %p2398_p0, %p2397_p12 }
  0x3d   : > { %p2393_p9 = pneg %p2392_p7 }
  0x3f   : > { %p2400_p1 = pnand %p2399_p2, %p2393_p9 }
  0x41   : > { %2403 = shalt.err (!%p2400_p1)
}
  0x42   : > { %s2548_s7 = smov 640   ;;  %s2549_s8 = smov 40  }
  0x43   : > { %2194 = dma.hbm_to_vmem [thread:$0]  (!%p2632_p11), %s3001_s3, 1280, %s2636_s28, [#allocation10], %s2548_s7, %s2548_s7, %s2549_s8  }
  0x44   : > { %s2691_s11 = sadd.s32 1, %s2542_s18   ;;  %s31_s13 = sadd.s32 1, %s2538_s17 }
  0x45   : > { %s28_s12 = ssub.s32 %s2542_s18, %s2691_s11  ;;  %p38_p6 = scmp.ne.s32.totalorder %s2538_s17, %s2534_s16 }
  0x46   : > { %p29_p13 = scmp.eq.s32.totalorder %s28_s12, 0  ;;  %p39_p10 = scmp.eq.s32.totalorder %s2542_s18, 0 }
  0x47   : > { %p3013_p5 = scmp.eq.s32.totalorder %s2602_s19, 1  ;;  %p2208_p9 = scmp.lt.s32.totalorder %s2542_s18, 2 }
  0x48   : > { %s2700_s14 = scalar_select %p29_p13, %s2538_s17, %s31_s13  }
  0x49   : > { %p40_p3 = por %p39_p10, %p38_p6  ;;  %p2704_p7 = por %p3013_p5, %p38_p6 }
  0x4a   : > { %s188_s26 = sand.u32 1, %s2538_s17   ;;  %s1776_s24 = sshll.u32 %s2542_s18, 6 }
  0x4b   : > { %s3014_s20 = scalar_select %p2704_p7, 1, 0 }
  0x4c   : > { %s2710_s28 = sshll.u32 %s188_s26, 2  ;;  %s2716_s30 = scalar_lea.hbm %s2998_s0, %s1776_s24 }
  0x4d   : > { %s192_s5 = scalar_lea.vmem [#allocation3], %s2710_s28  ;;  %p2721_p11 = pnand %p2208_p9, %p40_p3 }
  0x4e   : > { %s199_s6 = sshll.u32 %s192_s5, 4  ;;  %s2728_s9 = scalar_lea.hbm %s2999_s1, %s1776_s24  ;;  %s2719_s6 = int_to_ptr.vmem [resolvable:$true] %s199_s6 }
  0x4f   : > { %s206_s10 = sand.u32 1, %s2542_s18   ;;  %s189_s12 = scalar_lea.sflag [#allocation4], %s188_s26 }
  0x50   : > { %s2404_s13 = scalar_lea.hbm %s2716_s30, 64  ;;  %p2406_p0 = pneg %p2721_p11 }
  0x51   : > { %p2405_p12 = scmp.ne.s32.totalorder %s2716_s30, %s2404_s13  ;;  %s2409_s5 = scalar_lea.hbm %s2998_s0, 128 }
  0x52   : > { %p2410_p13 = scmp.lt.u32.totalorder %s2716_s30, %s2998_s0  ;;  %p2411_p6 = scmp.lt.u32.totalorder %s2409_s5, %s2404_s13 }
  0x53   : > { %p2407_p2 = pnand %p2406_p0, %p2405_p12  ;;  %p2413_p3 = scmp.lt.u32.totalorder %s2404_s13, %s2716_s30 }
  0x54   : > { %p2412_p10 = por %p2411_p6, %p2410_p13 }
  0x55   : > { %p2408_p1 = pneg %p2407_p2 }
  0x56   : > { %p2414_p5 = por %p2413_p3, %p2412_p10 }
  0x58   : > { %p2415_p9 = pnand %p2414_p5, %p2408_p1 }
  0x5a   : > { %2418 = shalt.err (!%p2415_p9)
}
  0x5b   : > { %s2419_s26 = scalar_lea.vmem %s2719_s6, 64  ;;  %s2550_s24 = smov [#allocation3]  }
  0x5c   : > { %p2420_p12 = scmp.ne.s32.totalorder %s2719_s6, %s2419_s26  ;;  %s2424_s8 = sshll.u32 %s2550_s24, 4  ;;  %s2425_s8 = int_to_ptr.vmem [resolvable:$false] %s2424_s8 }
  0x5d   : > { %s2426_s2 = scalar_lea.vmem %s2425_s8, 128  ;;  %p2427_p4 = scmp.lt.s32.totalorder %s2719_s6, %s2425_s8 }
  0x5e   : > { %p2422_p2 = pnand %p2420_p12, %p2406_p0  ;;  %p2428_p13 = scmp.lt.s32.totalorder %s2426_s2, %s2419_s26 }
  0x60   : > { %p2423_p7 = pneg %p2422_p2  ;;  %p2429_p6 = por %p2428_p13, %p2427_p4 }
  0x62   : > { %p2430_p10 = pnand %p2429_p6, %p2423_p7 }
  0x64   : > { %2433 = shalt.err (!%p2430_p10)
}
  0x65   : > { %2198 = dma.hbm_to_vmem [thread:$0]  (!%p2721_p11), %s2716_s30, 64, %s2719_s6, %s189_s12  }
  0x66   : > { %s210_s13 = scalar_lea.vmem [#allocation6], %s2710_s28  ;;  %s207_s29 = scalar_lea.sflag [#allocation7], %s206_s10 }
  0x67   : > { %s217_s27 = sshll.u32 %s210_s13, 4  ;;  %s2434_s5 = scalar_lea.hbm %s2728_s9, 64  ;;  %s218_s27 = int_to_ptr.vmem [resolvable:$true] %s217_s27 }
  0x68   : > { %p2435_p4 = scmp.ne.s32.totalorder %s2728_s9, %s2434_s5  ;;  %s2439_s24 = scalar_lea.hbm %s2999_s1, 128 }
  0x69   : > { %p2440_p3 = scmp.lt.u32.totalorder %s2728_s9, %s2999_s1  ;;  %p2441_p5 = scmp.lt.u32.totalorder %s2439_s24, %s2434_s5 }
  0x6a   : > { %p2437_p7 = pnand %p2435_p4, %p2406_p0  ;;  %p2443_p12 = scmp.lt.u32.totalorder %s2434_s5, %s2728_s9 }
  0x6b   : > { %p2442_p9 = por %p2441_p5, %p2440_p3 }
  0x6c   : > { %p2438_p1 = pneg %p2437_p7 }
  0x6d   : > { %p2444_p2 = por %p2443_p12, %p2442_p9 }
  0x6f   : > { %p2445_p13 = pnand %p2444_p2, %p2438_p1 }
  0x71   : > { %2448 = shalt.err (!%p2445_p13)
}
  0x72   : > { %s2449_s28 = scalar_lea.vmem %s218_s27, 64  ;;  %s2551_s30 = smov [#allocation6]  }
  0x73   : > { %p2450_p6 = scmp.ne.s32.totalorder %s218_s27, %s2449_s28  ;;  %s2454_s6 = sshll.u32 %s2551_s30, 4  ;;  %s2455_s6 = int_to_ptr.vmem [resolvable:$false] %s2454_s6 }
  0x74   : > { %s2456_s10 = scalar_lea.vmem %s2455_s6, 128  ;;  %p2457_p7 = scmp.lt.s32.totalorder %s218_s27, %s2455_s6 }
  0x75   : > { %p2452_p10 = pnand %p2450_p6, %p2406_p0  ;;  %p2458_p8 = scmp.lt.s32.totalorder %s2456_s10, %s2449_s28 }
  0x77   : > { %p2453_p4 = pneg %p2452_p10  ;;  %p2459_p3 = por %p2458_p8, %p2457_p7 }
  0x79   : > { %p2460_p5 = pnand %p2459_p3, %p2453_p4 }
  0x7b   : > { %2463 = shalt.err (!%p2460_p5)
}
  0x7c   : > { %2201 = dma.hbm_to_vmem [thread:$0]  (!%p2721_p11), %s2728_s9, 64, %s218_s27, %s207_s29  }
  0x7d   : > { %p3016_p1 = scmp.ne.s32.totalorder %s3010_s23, 0 }
  0x7e   : > { %s2781_s12 = sand.u32 (!%p3016_p1), 1, %s2534_s16   ;;  %p3017_p8 = scmp.ne.s32.totalorder (!%p3016_p1), %s3008_s21, 0 }
  0x7f   : > { %226 = sbr.rel (%p3016_p1) target bundleno = 2391 (0x957), region = 36  ;;  %s1780_s13 = sshll.u32 (!%p3016_p1), %s2781_s12, 2 }
  0x80   : > { %s229_s5 = scalar_lea.sflag (!%p3016_p1), [#allocation4], %s2781_s12  ;;  %s2785_s7 = scalar_lea.vmem (!%p3016_p1), [#allocation3], %s1780_s13 }
  0x86   : > { %2509 = dma.done.wait (%p3017_p8), %s229_s5, 64  }
  0x87   : > { %2511 = vsyncadd (%p3017_p8), %s229_s5, 4294967232  ;;  %s237_s25 = sand.u32 1, %s2602_s19   ;;  %s241_s9 = scalar_lea.vmem [#allocation6], %s1780_s13 }
  0x88   : > { %s238_s23 = scalar_lea.sflag [#allocation7], %s237_s25 }
  0x89   : > { %2513 = dma.done.wait (%p3017_p8), %s238_s23, 64  }
  0x8a   : > { %2515 = vsyncadd (%p3017_p8), %s238_s23, 4294967232  ;;  %p3018_p11 = scmp.eq.s32.totalorder %s2602_s19, 0 }
  0x8c   : > { %2517 = dma.done.wait (%p3018_p11), [#allocation7], 10240   ;;  %p3019_p0 = pmov %p3018_p11 }
  0x8e   : > { %2519 = vsyncadd (%p3019_p0), [#allocation7], 4294957056  ;;  %p3020_p9 = pmov %p3019_p0 }
  0x8f   : > { %p3021_p12 = pmov %p3019_p0 }
  0x90   : > { %2521 = dma.done.wait (%p3020_p9), [#allocation10], 1280  }
  0x91   : > { %2523 = vsyncadd (%p3021_p12), [#allocation10], 4294966016  ;;  %v2552_v0 = vmov 0   ;;  %v2253_v1 = vld [vmem:[#allocation9 + $0xc] ss:$40 sps:$4 sm:$0xff]   ;;  %vm341_vm0 = vcmask 130048  }
  0x92   : > { %418 = vmatprep.mubr.bf16.mxu1 %v2552_v0  ;;  %377 = vmatprep.mubr.bf16.mxu0 %v2552_v0  ;;  %v2255_v2 = vld [vmem:[#allocation9 + $0x8] ss:$40 sps:$4 sm:$0xff]   ;;  %v280_v3 = vld [vmem:[%s241_s9] sm:$0xf]  ;;  %v2553_v6 = vmov 0.0   ;;  %v2259_v7 = vld [vmem:[#allocation8] sm:$0xff]  }
  0x93   : > { %386 = vmatprep.subr.bf16.mxu1 %v2253_v1  ;;  %v2258_v4 = vld [vmem:[#allocation9 + $0x1c] ss:$40 sps:$4 sm:$0xff]   ;;  %v2256_v5 = vld [vmem:[#allocation9 + $0x18] ss:$40 sps:$4 sm:$0xff]   ;;  %v2260_v10 = vld [vmem:[#allocation8 + $0x8] sm:$0xff]   ;;  %vm2554_vm1 = vmmov 0  }
  0x94   : > { %387 = vmatpush1.bf16.msra.mxu1 %v2255_v2  ;;  %v2266_v8 = vld [vmem:[#allocation9 + $0x4] ss:$40 sps:$4 sm:$0xff]   ;;  %v2268_v9 = vld [vmem:[#allocation9] ss:$40 sps:$4 sm:$0xff]   ;;  %v2261_v11 = vld [vmem:[#allocation8 + $0x10] sm:$0xff]   ;;  %s1784_s21 = sshll.u32 %s2781_s12, 3 }
  0x95   : > { %468 = vmatprep.subr.bf16.mxu1 %v2258_v4  ;;  %345 = vmatprep.subr.bf16.mxu0 %v2266_v8  ;;  %v2262_v12 = vld [vmem:[#allocation8 + $0x18] sm:$0xff]   ;;  %v2263_v13 = vld [vmem:[#allocation8 + $0x20] sm:$0xff]   ;;  %v2264_v14 = vld [vmem:[#allocation8 + $0x28] sm:$0xff]   ;;  %s1881_s27 = sshll.u32 %s2602_s19, 7  ;;  %s278_s29 = scalar_lea.vmem [#allocation11], %s1784_s21 }
  0x96   : > { %346 = vmatpush1.bf16.msra.mxu0 %v2268_v9  ;;  %v2265_v15 = vld [vmem:[#allocation8 + $0x30] sm:$0xff]   ;;  %v2269_v16 = vld [vmem:[#allocation8 + $0x38] sm:$0xff]   ;;  %v2273_v20 = vld [vmem:[#allocation9 + $0x20] ss:$40 sps:$4 sm:$0xff]   ;;  %s1658_s26 = sshll.u32 %s278_s29, 4  ;;  %s2954_s2 = scalar_lea.hbm %s3002_s4, %s1881_s27  ;;  %s2956_s26 = int_to_ptr.vmem [resolvable:$true] %s1658_s26 }
  0x97   : > { %1796 = vmatmul.mubr.msk.bf16.vlgmr.msra.gmra.mrb[0].mxu1 %vm341_vm0, %v280_v3  ;;  %v560_v17 = vld [vmem:[%s2785_s7] sm:$0xf]  ;;  %v2275_v21 = vld [vmem:[#allocation9 + $0x24] ss:$40 sps:$4 sm:$0xff]   ;;  %v2279_v25 = vld [vmem:[#allocation8 + $0x58] sm:$0xff]   ;;  %s1645_s19 = scalar_lea.sflag [#allocation5], %s2781_s12 }
  0x98   : > { %469 = vmatpush1.bf16.msra.mxu1 %v2256_v5  ;;  %500 = vmatprep.mubr.bf16.mxu1 %v2552_v0  ;;  %v2270_v18 = vld [vmem:[#allocation9 + $0x10] ss:$40 sps:$4 sm:$0xff]   ;;  %v2272_v19 = vld [vmem:[#allocation9 + $0x14] ss:$40 sps:$4 sm:$0xff]   ;;  %v2276_v22 = vld [vmem:[#allocation8 + $0x40] sm:$0xff]   ;;  %s2464_s28 = scalar_lea.vmem %s2956_s26, 128 }
  0x99   : > { %1974 = vmatprep.subr.bf16.mxu1 %v2553_v6  ;;  %1795 = vmatmul.mubr.msk.bf16.vlgmr.msra.gmra.mrb[0].mxu0 %vm341_vm0, %v280_v3  ;;  %v2277_v23 = vld [vmem:[#allocation8 + $0x48] sm:$0xff]   ;;  %v2278_v24 = vld [vmem:[#allocation8 + $0x50] sm:$0xff]   ;;  %v2280_v26 = vld [vmem:[#allocation8 + $0x60] sm:$0xff]   ;;  %p2465_p2 = scmp.ne.s32.totalorder %s2956_s26, %s2464_s28  ;;  %p3022_p13 = scmp.ne.s32.totalorder %s3014_s20, 0 }
  0x9a   : > { %459 = vmatprep.mubr.bf16.mxu0 %v2552_v0  ;;  %427 = vmatprep.subr.bf16.mxu0 %v2272_v19  ;;  %v2281_v27 = vld [vmem:[#allocation8 + $0x68] sm:$0xff]   ;;  %v2282_v28 = vld [vmem:[#allocation8 + $0x70] sm:$0xff]   ;;  %v2283_v29 = vld [vmem:[#allocation8 + $0x78] sm:$0xff]   ;;  %s2555_s30 = smov [#allocation11]  }
  0x9b   : > { %428 = vmatpush1.bf16.msra.mxu0 %v2270_v18  ;;  %v2284_v30 = vld [vmem:[#allocation8 + $0x80] sm:$0xff]   ;;  %v2285_v31 = vld [vmem:[#allocation8 + $0x88] sm:$0xff]   ;;  %v2286_v32 = vld [vmem:[#allocation8 + $0x90] sm:$0xff]   ;;  %p2466_p6 = pnand %p2465_p2, %p3022_p13  ;;  %s2468_s6 = sshll.u32 %s2555_s30, 4  ;;  %s2469_s6 = int_to_ptr.vmem [resolvable:$false] %s2468_s6 }
  0x9c   : > { %509 = vmatprep.subr.bf16.mxu0 %v2275_v21  ;;  %v2287_v33 = vld [vmem:[#allocation8 + $0x98] sm:$0xff]   ;;  %v2288_v34 = vld [vmem:[#allocation8 + $0xa0] sm:$0xff]   ;;  %v2289_v35 = vld [vmem:[#allocation8 + $0xa8] sm:$0xff]   ;;  %s2470_s10 = scalar_lea.vmem %s2469_s6, 256  ;;  %p2471_p4 = scmp.lt.s32.totalorder %s2956_s26, %s2469_s6 }
  0x9d   : > { %v2291_v1 = vld [vmem:[#allocation8 + $0xb8] sm:$0xff]   ;;  %v2292_v2 = vld [vmem:[#allocation8 + $0xc0] sm:$0xff]   ;;  %v2294_v4 = vld [vmem:[#allocation8 + $0xd0] sm:$0xff]   ;;  %p2467_p10 = pneg %p2466_p6  ;;  %p2472_p7 = scmp.lt.s32.totalorder %s2470_s10, %s2464_s28 }
  0x9e   : > { %v2295_v5 = vld [vmem:[#allocation8 + $0xd8] sm:$0xff]   ;;  %v2297_v8 = vld [vmem:[#allocation8 + $0xe8] sm:$0xff]   ;;  %v2300_v19 = vld [vmem:[#allocation8 + $0x100] sm:$0xff]  }
  0x9f   : > { %1798 = vmatmul.mubr.msk.bf16.vlgmr.msra.gmra.mrb[4].mxu1 %vm341_vm0, %v280_v3  ;;  %v2299_v18 = vld [vmem:[#allocation8 + $0xf8] sm:$0xff]   ;;  %v2302_v21 = vld [vmem:[#allocation8 + $0x110] sm:$0xff]   ;;  %p2473_p3 = por %p2472_p7, %p2471_p4 }
  0xa0   : > { %1975 = vmatpush3.bf16.msra.mxu1 %v2259_v7  ;;  %1990 = vmatprep.mubr.msk.bf16.mxu1 %vm2554_vm1, %v2553_v6  ;;  %v2296_v7 = vld [vmem:[#allocation8 + $0xe0] sm:$0xff]  }
  0xa1   : > { %1976 = vmatprep.subr.bf16.mxu1 %v2553_v6  ;;  %1797 = vmatmul.mubr.msk.bf16.vlgmr.msra.gmra.mrb[4].mxu0 %vm341_vm0, %v280_v3  ;;  %p2474_p5 = pnand %p2473_p3, %p2467_p10 }
  0xa2   : > { %541 = vmatprep.mubr.bf16.mxu0 %v2552_v0  ;;  %510 = vmatpush1.bf16.msra.mxu0 %v2273_v20  ;;  %v2290_v0 = vld [vmem:[#allocation8 + $0xb0] sm:$0xff]   ;;  %v2301_v20 = vld [vmem:[#allocation8 + $0x108] sm:$0xff]  }
  0xa3   : > { %1994 = vmatprep.subr.bf16.mxu0 %v2553_v6 }
  0xa4   : > { %1977 = vmatpush3.bf16.msra.mxu1 %v2260_v10 }
  0xa5   : > { %1978 = vmatprep.subr.bf16.mxu1 %v2553_v6 }
  0xa8   : > { %1979 = vmatpush3.bf16.msra.mxu1 %v2261_v11 }
  0xa9   : > { %1980 = vmatprep.subr.bf16.mxu1 %v2553_v6  ;;  %1799 = vmatmul.mubr.msk.bf16.vlgmr.msra.gmra.mrb[8].mxu0 %vm341_vm0, %v280_v3  ;;  %v2293_v3 = vld [vmem:[#allocation8 + $0xc8] sm:$0xff]  }
  0xaa   : > { %1995 = vmatpush3.bf16.msra.mxu0 %v2276_v22  ;;  %2010 = vmatprep.mubr.msk.bf16.mxu0 %vm2554_vm1, %v2553_v6  ;;  %v2303_v22 = vld [vmem:[#allocation8 + $0x118] sm:$0xff]  }
  0xab   : > { %1996 = vmatprep.subr.bf16.mxu0 %v2553_v6 }
  0xac   : > { %1981 = vmatpush3.bf16.msra.mxu1 %v2262_v12 }
  0xad   : > { %1982 = vmatprep.subr.bf16.mxu1 %v2553_v6 }
  0xae   : > { %1997 = vmatpush3.bf16.msra.mxu0 %v2277_v23  ;;  %v2304_v23 = vld [vmem:[#allocation8 + $0x120] sm:$0xff]  }
  0xaf   : > { %1998 = vmatprep.subr.bf16.mxu0 %v2553_v6 }
  0xb0   : > { %1983 = vmatpush3.bf16.msra.mxu1 %v2263_v13 }
  0xb1   : > { %1984 = vmatprep.subr.bf16.mxu1 %v2553_v6 }
  0xb2   : > { %1999 = vmatpush3.bf16.msra.mxu0 %v2278_v24  ;;  %v2305_v24 = vld [vmem:[#allocation8 + $0x128] sm:$0xff]  }
  0xb3   : > { %2000 = vmatprep.subr.bf16.mxu0 %v2553_v6 }
  0xb4   : > { %1985 = vmatpush3.bf16.msra.mxu1 %v2264_v14 }
  0xb5   : > { %1986 = vmatprep.subr.bf16.mxu1 %v2553_v6 }
  0xb6   : > { %2001 = vmatpush3.bf16.msra.mxu0 %v2279_v25 }
  0xb7   : > { %2002 = vmatprep.subr.bf16.mxu0 %v2553_v6 }
  0xb8   : > { %1987 = vmatpush3.bf16.msra.mxu1 %v2265_v15 }
  0xb9   : > { %1988 = vmatprep.subr.bf16.mxu1 %v2553_v6 }
  0xba   : > { %2003 = vmatpush3.bf16.msra.mxu0 %v2280_v26 }
  0xbb   : > { %2004 = vmatprep.subr.bf16.mxu0 %v2553_v6 }
  0xbc   : > { %1989 = vmatpush3.bf16.msra.mxu1 %v2269_v16 }
  0xbd   : > { %2014 = vmatprep.subr.bf16.mxu1 %v2553_v6 }
  0xbe   : > { %2005 = vmatpush3.bf16.msra.mxu0 %v2281_v27 }
  0xbf   : > { %1991 = vmatmul.mubr.bf16.vlgmr.msra.gmra.mrb[8].mxu1 %v560_v17  ;;  %2006 = vmatprep.subr.bf16.mxu0 %v2553_v6  ;;  %v2298_v17 = vld [vmem:[#allocation8 + $0xf0] sm:$0xff]  }
  0xc0   : > { %2030 = vmatprep.mubr.msk.bf16.mxu1 %vm2554_vm1, %v2553_v6  ;;  %2015 = vmatpush3.bf16.msra.mxu1 %v2284_v30 }
  0xc1   : > { %2016 = vmatprep.subr.bf16.mxu1 %v2553_v6 }
  0xc2   : > { %2007 = vmatpush3.bf16.msra.mxu0 %v2282_v28 }
  0xc3   : > { %2008 = vmatprep.subr.bf16.mxu0 %v2553_v6 }
  0xc4   : > { %2017 = vmatpush3.bf16.msra.mxu1 %v2285_v31 }
  0xc5   : > { %2018 = vmatprep.subr.bf16.mxu1 %v2553_v6 }
  0xc6   : > { %2009 = vmatpush3.bf16.msra.mxu0 %v2283_v29 }
  0xc7   : > { %2034 = vmatprep.subr.bf16.mxu0 %v2553_v6 }
  0xc8   : > { %2019 = vmatpush3.bf16.msra.mxu1 %v2286_v32  ;;  %v2306_v32 = vld [vmem:[#allocation8 + $0x130] sm:$0xff]  }
  0xc9   : > { %2020 = vmatprep.subr.bf16.mxu1 %v2553_v6 }
  0xcc   : > { %2021 = vmatpush3.bf16.msra.mxu1 %v2287_v33  ;;  %v2307_v33 = vld [vmem:[#allocation8 + $0x138] sm:$0xff]  }
  0xcd   : > { %2022 = vmatprep.subr.bf16.mxu1 %v2553_v6 }
  0xd0   : > { %2023 = vmatpush3.bf16.msra.mxu1 %v2288_v34  ;;  %v2308_v34 = vld [vmem:[#allocation8 + $0x140] sm:$0xff]  }
  0xd1   : > { %2024 = vmatprep.subr.bf16.mxu1 %v2553_v6 }
  0xd4   : > { %2025 = vmatpush3.bf16.msra.mxu1 %v2289_v35  ;;  %v2309_v35 = vld [vmem:[#allocation8 + $0x148] sm:$0xff]  }
  0xd5   : > { %2026 = vmatprep.subr.bf16.mxu1 %v2553_v6 }
  0xd8   : > { %2027 = vmatpush3.bf16.msra.mxu1 %v2290_v0 }
  0xd9   : > { %2028 = vmatprep.subr.bf16.mxu1 %v2553_v6 }
  0xdc   : > { %2029 = vmatpush3.bf16.msra.mxu1 %v2291_v1 }
  0xdd   : > { %2054 = vmatprep.subr.bf16.mxu1 %v2553_v6 }
 0x16a   : > { %v2840_v36 = vpop.f32.mrb[0].mxu1 }
 0x16b   : > { %v2842_v37 = vpop.f32.mrb[1].mxu1 }
 0x16c   : > { %v424_v38 = vpop.f32.mrb[2].mxu1  ;;  %v379_v43 = vpop.f32.mrb[0].mxu0 }
 0x16d   : > { %v425_v39 = vpop.f32.mrb[3].mxu1  ;;  %v381_v45 = vpop.f32.mrb[1].mxu0  ;;  %v2311_v38 = vld [vmem:[#allocation8 + $0x158] sm:$0xff]  }
 0x16e   : > { %v383_v46 = vpop.f32.mrb[2].mxu0  ;;  %v2312_v39 = vld [vmem:[#allocation8 + $0x160] sm:$0xff]  }
 0x16f   : > { %v384_v47 = vpop.f32.mrb[3].mxu0 }
 0x172   : > { %v2844_v40 = vpop.f32.mrb[4].mxu1 }
 0x173   : > { %v2846_v41 = vpop.f32.mrb[5].mxu1 }
 0x174   : > { %v506_v42 = vpop.f32.mrb[6].mxu1  ;;  %v2854_v56 = vpop.f32.mrb[4].mxu0 }
 0x175   : > { %v507_v44 = vpop.f32.mrb[7].mxu1  ;;  %v2856_v57 = vpop.f32.mrb[5].mxu0  ;;  %v2313_v42 = vld [vmem:[#allocation8 + $0x168] sm:$0xff]  }
 0x176   : > { %v465_v58 = vpop.f32.mrb[6].mxu0 }
 0x177   : > { %v466_v59 = vpop.f32.mrb[7].mxu0  ;;  %v2320_v58 = vld [vmem:[#allocation8 + $0x1a0] sm:$0xff]  }
 0x178   : > { %v2321_v59 = vld [vmem:[#allocation8 + $0x1a8] sm:$0xff]  }
 0x17c   : > { %v2858_v60 = vpop.f32.mrb[8].mxu0 }
 0x17d   : > { %v2860_v61 = vpop.f32.mrb[9].mxu0 }
 0x17e   : > { %v547_v62 = vpop.f32.mrb[10].mxu0 }
 0x17f   : > { %v548_v63 = vpop.f32.mrb[11].mxu0 }
 0x192   : > { %v660_v48 = vpop.f32.mrb[8].mxu1 }
 0x193   : > { %v661_v49 = vadd.f32 %v660_v48, %v379_v43  ;;  %v1992_v50 = vpop.f32.mrb[9].mxu1 }
 0x194   : > { %v663_v51 = vpop.f32.mrb[10].mxu1 }
 0x195   : > { %v666_v52 = vmul.f32 0.01, %v661_v49  ;;  %v1993_v53 = vpop.f32.mrb[11].mxu1  ;;  %v2314_v51 = vld [vmem:[#allocation8 + $0x170] sm:$0xff]  }
 0x196   : > { %v2316_v53 = vld [vmem:[#allocation8 + $0x180] sm:$0xff]  }
 0x197   : > { %v2848_v54 = vmax.f32 %v661_v49, %v666_v52  ;;  %v2315_v52 = vld [vmem:[#allocation8 + $0x178] sm:$0xff]  }
 0x199   : > { %v685_v55 = vpack.c.bf16 %v2848_v54, %v2848_v54 }
 0x19b   : > { %2011 = vmatmul.mubr.bf16.vlgmr.msra.gmra.mrb[12].mxu0 %v685_v55  ;;  %v2319_v55 = vld [vmem:[#allocation8 + $0x198] sm:$0xff]  }
 0x19c   : > { %2050 = vmatprep.mubr.msk.bf16.mxu0 %vm2554_vm1, %v2553_v6  ;;  %2035 = vmatpush3.bf16.msra.mxu0 %v2292_v2 }
 0x19d   : > { %2036 = vmatprep.subr.bf16.mxu0 %v2553_v6 }
 0x1a0   : > { %2037 = vmatpush3.bf16.msra.mxu0 %v2293_v3 }
 0x1a1   : > { %2038 = vmatprep.subr.bf16.mxu0 %v2553_v6 }
 0x1a4   : > { %2039 = vmatpush3.bf16.msra.mxu0 %v2294_v4 }
 0x1a5   : > { %2040 = vmatprep.subr.bf16.mxu0 %v2553_v6 }
 0x1a8   : > { %2041 = vmatpush3.bf16.msra.mxu0 %v2295_v5  ;;  %v2322_v5 = vld [vmem:[#allocation8 + $0x1b0] sm:$0xff]  }
 0x1a9   : > { %2042 = vmatprep.subr.bf16.mxu0 %v2553_v6 }
 0x1ac   : > { %2043 = vmatpush3.bf16.msra.mxu0 %v2296_v7  ;;  %v2323_v7 = vld [vmem:[#allocation8 + $0x1b8] sm:$0xff]  }
 0x1ad   : > { %2044 = vmatprep.subr.bf16.mxu0 %v2553_v6 }
 0x1b0   : > { %2045 = vmatpush3.bf16.msra.mxu0 %v2297_v8  ;;  %v2325_v8 = vld [vmem:[#allocation8 + $0x1c8] sm:$0xff]  }
 0x1b1   : > { %2046 = vmatprep.subr.bf16.mxu0 %v2553_v6 }
 0x1b4   : > { %2047 = vmatpush3.bf16.msra.mxu0 %v2298_v17 }
 0x1b5   : > { %2048 = vmatprep.subr.bf16.mxu0 %v2553_v6 }
 0x1b8   : > { %2049 = vmatpush3.bf16.msra.mxu0 %v2299_v18 }
 0x1b9   : > { %2074 = vmatprep.subr.bf16.mxu0 %v2553_v6 }
 0x26e   : > { %v769_v9 = vpop.f32.mrb[12].mxu0 }
 0x26f   : > { %v770_v10 = vadd.f32 %v769_v9, %v381_v45  ;;  %v2012_v11 = vpop.f32.mrb[13].mxu0  ;;  %v2326_v9 = vld [vmem:[#allocation8 + $0x1d0] sm:$0xff]  }
 0x270   : > { %v772_v12 = vpop.f32.mrb[14].mxu0  ;;  %v2328_v11 = vld [vmem:[#allocation8 + $0x1e0] sm:$0xff]  }
 0x271   : > { %v775_v13 = vmul.f32 0.01, %v770_v10  ;;  %v2013_v14 = vpop.f32.mrb[15].mxu0  ;;  %v2329_v12 = vld [vmem:[#allocation8 + $0x1e8] sm:$0xff]  }
 0x273   : > { %v776_v15 = vmax.f32 %v770_v10, %v775_v13  ;;  %v2327_v10 = vld [vmem:[#allocation8 + $0x1d8] sm:$0xff]  }
 0x275   : > { %v794_v16 = vpack.c.bf16 %v776_v15, %v776_v15 }
 0x277   : > { %2031 = vmatmul.mubr.bf16.vlgmr.msra.gmra.mrb[12].mxu1 %v794_v16 }
 0x278   : > { %2070 = vmatprep.mubr.msk.bf16.mxu1 %vm2554_vm1, %v2553_v6  ;;  %2055 = vmatpush3.bf16.msra.mxu1 %v2300_v19 }
 0x279   : > { %2056 = vmatprep.subr.bf16.mxu1 %v2553_v6 }
 0x27c   : > { %2057 = vmatpush3.bf16.msra.mxu1 %v2301_v20 }
 0x27d   : > { %2058 = vmatprep.subr.bf16.mxu1 %v2553_v6 }
 0x280   : > { %2059 = vmatpush3.bf16.msra.mxu1 %v2302_v21  ;;  %v2330_v21 = vld [vmem:[#allocation8 + $0x1f0] sm:$0xff]  }
 0x281   : > { %2060 = vmatprep.subr.bf16.mxu1 %v2553_v6 }
 0x284   : > { %2061 = vmatpush3.bf16.msra.mxu1 %v2303_v22  ;;  %v2331_v22 = vld [vmem:[#allocation8 + $0x1f8] sm:$0xff]  }
 0x285   : > { %2062 = vmatprep.subr.bf16.mxu1 %v2553_v6 }
 0x288   : > { %2063 = vmatpush3.bf16.msra.mxu1 %v2304_v23  ;;  %v2332_v23 = vld [vmem:[#allocation8 + $0x200] sm:$0xff]  }
 0x289   : > { %2064 = vmatprep.subr.bf16.mxu1 %v2553_v6 }
 0x28c   : > { %2065 = vmatpush3.bf16.msra.mxu1 %v2305_v24  ;;  %v2334_v24 = vld [vmem:[#allocation8 + $0x210] sm:$0xff]  }
 0x28d   : > { %2066 = vmatprep.subr.bf16.mxu1 %v2553_v6 }
 0x290   : > { %2067 = vmatpush3.bf16.msra.mxu1 %v2306_v32 }
 0x291   : > { %2068 = vmatprep.subr.bf16.mxu1 %v2553_v6 }
 0x294   : > { %2069 = vmatpush3.bf16.msra.mxu1 %v2307_v33 }
 0x295   : > { %2094 = vmatprep.subr.bf16.mxu1 %v2553_v6 }
 0x34a   : > { %v878_v25 = vpop.f32.mrb[12].mxu1 }
 0x34b   : > { %v879_v26 = vadd.f32 %v878_v25, %v2840_v36  ;;  %v2032_v27 = vpop.f32.mrb[13].mxu1  ;;  %v2310_v36 = vld [vmem:[#allocation8 + $0x150] sm:$0xff]   ;;  %v2335_v25 = vld [vmem:[#allocation8 + $0x218] sm:$0xff]  }
 0x34c   : > { %v881_v28 = vpop.f32.mrb[14].mxu1  ;;  %v2337_v27 = vld [vmem:[#allocation8 + $0x228] sm:$0xff]  }
 0x34d   : > { %v2882_v29 = vadd.f32 %v879_v26, %v2848_v54  ;;  %v2033_v30 = vpop.f32.mrb[15].mxu1  ;;  %v2318_v54 = vld [vmem:[#allocation8 + $0x190] sm:$0xff]   ;;  %v2336_v26 = vld [vmem:[#allocation8 + $0x220] sm:$0xff]  }
 0x34f   : > { %v902_v31 = vpack.c.bf16 %v2882_v29, %v2882_v29 }
 0x351   : > { %2051 = vmatmul.mubr.bf16.vlgmr.msra.gmra.mrb[16].mxu0 %v902_v31 }
 0x352   : > { %2090 = vmatprep.mubr.msk.bf16.mxu0 %vm2554_vm1, %v2553_v6  ;;  %2075 = vmatpush3.bf16.msra.mxu0 %v2308_v34 }
 0x353   : > { %2076 = vmatprep.subr.bf16.mxu0 %v2553_v6 }
 0x356   : > { %2077 = vmatpush3.bf16.msra.mxu0 %v2309_v35  ;;  %v2338_v35 = vld [vmem:[#allocation8 + $0x230] sm:$0xff]  }
 0x357   : > { %2078 = vmatprep.subr.bf16.mxu0 %v2553_v6 }
 0x35a   : > { %2079 = vmatpush3.bf16.msra.mxu0 %v2310_v36  ;;  %v2339_v36 = vld [vmem:[#allocation8 + $0x238] sm:$0xff]  }
 0x35b   : > { %2080 = vmatprep.subr.bf16.mxu0 %v2553_v6 }
 0x35e   : > { %2081 = vmatpush3.bf16.msra.mxu0 %v2311_v38  ;;  %v2340_v38 = vld [vmem:[#allocation8 + $0x240] sm:$0xff]  }
 0x35f   : > { %2082 = vmatprep.subr.bf16.mxu0 %v2553_v6 }
 0x362   : > { %2083 = vmatpush3.bf16.msra.mxu0 %v2312_v39  ;;  %v2341_v39 = vld [vmem:[#allocation8 + $0x248] sm:$0xff]  }
 0x363   : > { %2084 = vmatprep.subr.bf16.mxu0 %v2553_v6 }
 0x366   : > { %2085 = vmatpush3.bf16.msra.mxu0 %v2313_v42  ;;  %v2343_v42 = vld [vmem:[#allocation8 + $0x258] sm:$0xff]  }
 0x367   : > { %2086 = vmatprep.subr.bf16.mxu0 %v2553_v6 }
 0x36a   : > { %2087 = vmatpush3.bf16.msra.mxu0 %v2314_v51 }
 0x36b   : > { %2088 = vmatprep.subr.bf16.mxu0 %v2553_v6 }
 0x36e   : > { %2089 = vmatpush3.bf16.msra.mxu0 %v2315_v52 }
 0x36f   : > { %2114 = vmatprep.subr.bf16.mxu0 %v2553_v6 }
 0x424   : > { %v986_v43 = vpop.f32.mrb[16].mxu0 }
 0x425   : > { %v987_v44 = vadd.f32 %v986_v43, %v2842_v37  ;;  %v2052_v45 = vpop.f32.mrb[17].mxu0  ;;  %v2317_v37 = vld [vmem:[#allocation8 + $0x188] sm:$0xff]   ;;  %v2344_v43 = vld [vmem:[#allocation8 + $0x260] sm:$0xff]  }
 0x426   : > { %v989_v46 = vpop.f32.mrb[18].mxu0 }
 0x427   : > { %v992_v47 = vmul.f32 0.01, %v987_v44  ;;  %v2053_v48 = vpop.f32.mrb[19].mxu0 }
 0x429   : > { %v993_v49 = vmax.f32 %v987_v44, %v992_v47  ;;  %v2345_v44 = vld [vmem:[#allocation8 + $0x268] sm:$0xff]  }
 0x42b   : > { %v1011_v50 = vpack.c.bf16 %v993_v49, %v993_v49 }
 0x42d   : > { %2071 = vmatmul.mubr.bf16.vlgmr.msra.gmra.mrb[16].mxu1 %v1011_v50 }
 0x42e   : > { %2110 = vmatprep.mubr.msk.bf16.mxu1 %vm2554_vm1, %v2553_v6  ;;  %2095 = vmatpush3.bf16.msra.mxu1 %v2316_v53  ;;  %v2346_v53 = vld [vmem:[#allocation8 + $0x270] sm:$0xff]  }
 0x42f   : > { %2096 = vmatprep.subr.bf16.mxu1 %v2553_v6 }
 0x432   : > { %2097 = vmatpush3.bf16.msra.mxu1 %v2317_v37  ;;  %v2347_v37 = vld [vmem:[#allocation8 + $0x278] sm:$0xff]  }
 0x433   : > { %2098 = vmatprep.subr.bf16.mxu1 %v2553_v6 }
 0x436   : > { %2099 = vmatpush3.bf16.msra.mxu1 %v2318_v54 }
 0x437   : > { %2100 = vmatprep.subr.bf16.mxu1 %v2553_v6 }
 0x43a   : > { %2101 = vmatpush3.bf16.msra.mxu1 %v2319_v55 }
 0x43b   : > { %2102 = vmatprep.subr.bf16.mxu1 %v2553_v6 }
 0x43e   : > { %2103 = vmatpush3.bf16.msra.mxu1 %v2320_v58 }
 0x43f   : > { %2104 = vmatprep.subr.bf16.mxu1 %v2553_v6 }
 0x442   : > { %2105 = vmatpush3.bf16.msra.mxu1 %v2321_v59 }
 0x443   : > { %2106 = vmatprep.subr.bf16.mxu1 %v2553_v6 }
 0x446   : > { %2107 = vmatpush3.bf16.msra.mxu1 %v2322_v5 }
 0x447   : > { %2108 = vmatprep.subr.bf16.mxu1 %v2553_v6 }
 0x44a   : > { %2109 = vmatpush3.bf16.msra.mxu1 %v2323_v7 }
 0x44b   : > { %2134 = vmatprep.subr.bf16.mxu1 %v2553_v6 }
 0x500   : > { %v1095_v62 = vpop.f32.mrb[16].mxu1 }
 0x501   : > { %v1096_v63 = vadd.f32 %v1095_v62, %v2854_v56  ;;  %v2072_v0 = vpop.f32.mrb[17].mxu1  ;;  %v2324_v56 = vld [vmem:[#allocation8 + $0x1c0] sm:$0xff]  }
 0x502   : > { %v1098_v1 = vpop.f32.mrb[18].mxu1 }
 0x503   : > { %v2909_v2 = vadd.f32 %v1096_v63, %v2882_v29  ;;  %v2073_v3 = vpop.f32.mrb[19].mxu1 }
 0x505   : > { %v1119_v4 = vpack.c.bf16 %v2909_v2, %v2909_v2 }
 0x507   : > { %2091 = vmatmul.mubr.bf16.vlgmr.msra.gmra.mrb[20].mxu0 %v1119_v4 }
 0x508   : > { %2130 = vmatprep.mubr.msk.bf16.mxu0 %vm2554_vm1, %v2553_v6  ;;  %2115 = vmatpush3.bf16.msra.mxu0 %v2324_v56 }
 0x509   : > { %2116 = vmatprep.subr.bf16.mxu0 %v2553_v6 }
 0x50c   : > { %2117 = vmatpush3.bf16.msra.mxu0 %v2325_v8 }
 0x50d   : > { %2118 = vmatprep.subr.bf16.mxu0 %v2553_v6 }
 0x510   : > { %2119 = vmatpush3.bf16.msra.mxu0 %v2326_v9 }
 0x511   : > { %2120 = vmatprep.subr.bf16.mxu0 %v2553_v6 }
 0x514   : > { %2121 = vmatpush3.bf16.msra.mxu0 %v2327_v10 }
 0x515   : > { %2122 = vmatprep.subr.bf16.mxu0 %v2553_v6 }
 0x518   : > { %2123 = vmatpush3.bf16.msra.mxu0 %v2328_v11 }
 0x519   : > { %2124 = vmatprep.subr.bf16.mxu0 %v2553_v6 }
 0x51c   : > { %2125 = vmatpush3.bf16.msra.mxu0 %v2329_v12 }
 0x51d   : > { %2126 = vmatprep.subr.bf16.mxu0 %v2553_v6 }
 0x520   : > { %2127 = vmatpush3.bf16.msra.mxu0 %v2330_v21 }
 0x521   : > { %2128 = vmatprep.subr.bf16.mxu0 %v2553_v6 }
 0x524   : > { %2129 = vmatpush3.bf16.msra.mxu0 %v2331_v22 }
 0x525   : > { %2154 = vmatprep.subr.bf16.mxu0 %v2553_v6 }
 0x5da   : > { %v1203_v13 = vpop.f32.mrb[20].mxu0 }
 0x5db   : > { %v1204_v14 = vadd.f32 %v1203_v13, %v2856_v57  ;;  %v2092_v15 = vpop.f32.mrb[21].mxu0  ;;  %v2333_v57 = vld [vmem:[#allocation8 + $0x208] sm:$0xff]  }
 0x5dc   : > { %v1206_v16 = vpop.f32.mrb[22].mxu0 }
 0x5dd   : > { %v1209_v17 = vmul.f32 0.01, %v1204_v14  ;;  %v2093_v18 = vpop.f32.mrb[23].mxu0 }
 0x5df   : > { %v1210_v19 = vmax.f32 %v1204_v14, %v1209_v17 }
 0x5e1   : > { %v1228_v20 = vpack.c.bf16 %v1210_v19, %v1210_v19 }
 0x5e3   : > { %2111 = vmatmul.mubr.bf16.vlgmr.msra.gmra.mrb[20].mxu1 %v1228_v20 }
 0x5e4   : > { %2150 = vmatprep.mubr.msk.bf16.mxu1 %vm2554_vm1, %v2553_v6  ;;  %2135 = vmatpush3.bf16.msra.mxu1 %v2332_v23 }
 0x5e5   : > { %2136 = vmatprep.subr.bf16.mxu1 %v2553_v6 }
 0x5e8   : > { %2137 = vmatpush3.bf16.msra.mxu1 %v2333_v57 }
 0x5e9   : > { %2138 = vmatprep.subr.bf16.mxu1 %v2553_v6 }
 0x5ec   : > { %2139 = vmatpush3.bf16.msra.mxu1 %v2334_v24 }
 0x5ed   : > { %2140 = vmatprep.subr.bf16.mxu1 %v2553_v6 }
 0x5f0   : > { %2141 = vmatpush3.bf16.msra.mxu1 %v2335_v25 }
 0x5f1   : > { %2142 = vmatprep.subr.bf16.mxu1 %v2553_v6 }
 0x5f4   : > { %2143 = vmatpush3.bf16.msra.mxu1 %v2336_v26 }
 0x5f5   : > { %2144 = vmatprep.subr.bf16.mxu1 %v2553_v6 }
 0x5f8   : > { %2145 = vmatpush3.bf16.msra.mxu1 %v2337_v27 }
 0x5f9   : > { %2146 = vmatprep.subr.bf16.mxu1 %v2553_v6 }
 0x5fc   : > { %2147 = vmatpush3.bf16.msra.mxu1 %v2338_v35 }
 0x5fd   : > { %2148 = vmatprep.subr.bf16.mxu1 %v2553_v6 }
 0x600   : > { %2149 = vmatpush3.bf16.msra.mxu1 %v2339_v36 }
 0x6b6   : > { %v1312_v28 = vpop.f32.mrb[20].mxu1 }
 0x6b7   : > { %v1313_v29 = vadd.f32 %v1312_v28, %v2844_v40  ;;  %v2112_v30 = vpop.f32.mrb[21].mxu1  ;;  %v2342_v40 = vld [vmem:[#allocation8 + $0x250] sm:$0xff]  }
 0x6b8   : > { %v1315_v31 = vpop.f32.mrb[22].mxu1 }
 0x6b9   : > { %v1318_v32 = vadd.f32 %v1313_v29, %v2909_v2  ;;  %v2113_v33 = vpop.f32.mrb[23].mxu1 }
 0x6bb   : > { %v1336_v34 = vpack.c.bf16 %v1318_v32, %v1318_v32 }
 0x6bd   : > { %2131 = vmatmul.mubr.bf16.vlgmr.msra.gmra.mrb[24].mxu0 %v1336_v34 }
 0x6be   : > { %2170 = vmatprep.mubr.msk.bf16.mxu0 %vm2554_vm1, %v2553_v6  ;;  %2155 = vmatpush3.bf16.msra.mxu0 %v2340_v38 }
 0x6bf   : > { %2156 = vmatprep.subr.bf16.mxu0 %v2553_v6 }
 0x6c2   : > { %2157 = vmatpush3.bf16.msra.mxu0 %v2341_v39 }
 0x6c3   : > { %2158 = vmatprep.subr.bf16.mxu0 %v2553_v6 }
 0x6c6   : > { %2159 = vmatpush3.bf16.msra.mxu0 %v2342_v40 }
 0x6c7   : > { %2160 = vmatprep.subr.bf16.mxu0 %v2553_v6 }
 0x6ca   : > { %2161 = vmatpush3.bf16.msra.mxu0 %v2343_v42 }
 0x6cb   : > { %2162 = vmatprep.subr.bf16.mxu0 %v2553_v6 }
 0x6ce   : > { %2163 = vmatpush3.bf16.msra.mxu0 %v2344_v43 }
 0x6cf   : > { %2164 = vmatprep.subr.bf16.mxu0 %v2553_v6 }
 0x6d2   : > { %2165 = vmatpush3.bf16.msra.mxu0 %v2345_v44 }
 0x6d3   : > { %2166 = vmatprep.subr.bf16.mxu0 %v2553_v6 }
 0x6d6   : > { %2167 = vmatpush3.bf16.msra.mxu0 %v2346_v53 }
 0x6d7   : > { %2168 = vmatprep.subr.bf16.mxu0 %v2553_v6 }
 0x6da   : > { %2169 = vmatpush3.bf16.msra.mxu0 %v2347_v37 }
 0x790   : > { %v1420_v45 = vpop.f32.mrb[24].mxu0 }
 0x791   : > { %v1421_v46 = vadd.f32 %v1420_v45, %v2846_v41  ;;  %v2132_v47 = vpop.f32.mrb[25].mxu0 }
 0x792   : > { %v1423_v48 = vpop.f32.mrb[26].mxu0 }
 0x793   : > { %v1426_v49 = vmul.f32 0.01, %v1421_v46  ;;  %v2133_v50 = vpop.f32.mrb[27].mxu0 }
 0x795   : > { %v1427_v51 = vmax.f32 %v1421_v46, %v1426_v49 }
 0x797   : > { %v1445_v52 = vpack.c.bf16 %v1427_v51, %v1427_v51 }
 0x799   : > { %2151 = vmatmul.mubr.bf16.vlgmr.msra.gmra.mrb[24].mxu1 %v1445_v52 }
 0x86c   : > { %v1529_v54 = vpop.f32.mrb[24].mxu1 }
 0x86d   : > { %v1530_v55 = vadd.f32 %v1529_v54, %v2858_v60  ;;  %v2152_v58 = vpop.f32.mrb[25].mxu1 }
 0x86e   : > { %v1532_v41 = vpop.f32.mrb[26].mxu1 }
 0x86f   : > { %v1535_v59 = vadd.f32 %v1530_v55, %v1318_v32  ;;  %v2153_v62 = vpop.f32.mrb[27].mxu1 }
 0x871   : > { %v1553_v63 = vpack.c.bf16 %v1535_v59, %v1535_v59 }
 0x873   : > { %2171 = vmatmul.mubr.bf16.vlgmr.msra.gmra.mrb[28].mxu0 %v1553_v63 }
 0x946   : > { %v1637_v0 = vpop.f32.mrb[28].mxu0 }
 0x947   : > { %v1638_v6 = vadd.f32 %v1637_v0, %v2860_v61  ;;  %v2172_v1 = vpop.f32.mrb[29].mxu0 }
 0x948   : > { %v1640_v60 = vpop.f32.mrb[30].mxu0 }
 0x949   : > { %1643 = vst [vmem:[%s278_s29] sm:$0xff] %v1638_v6  ;;  %v2173_v2 = vpop.f32.mrb[31].mxu0 }
 0x94a   : > { %2477 = shalt.err (!%p2474_p5)
}
 0x94b   : > { %s2478_s12 = scalar_lea.hbm %s2954_s2, 128  ;;  %s2482_s7 = scalar_lea.hbm %s3002_s4, 256 }
 0x94c   : > { %p2479_p1 = scmp.ne.s32.totalorder %s2954_s2, %s2478_s12  ;;  %p2483_p0 = scmp.lt.u32.totalorder %s2954_s2, %s3002_s4 }
 0x94d   : > { %p2484_p9 = scmp.lt.u32.totalorder %s2482_s7, %s2478_s12  ;;  %p2486_p2 = scmp.lt.u32.totalorder %s2478_s12, %s2954_s2 }
 0x94e   : > { %p2480_p8 = pnand %p2479_p1, %p3022_p13 }
 0x94f   : > { %p2485_p12 = por %p2484_p9, %p2483_p0 }
 0x950   : > { %p2481_p11 = pneg %p2480_p8 }
 0x951   : > { %p2487_p6 = por %p2486_p2, %p2485_p12 }
 0x953   : > { %p2488_p10 = pnand %p2487_p6, %p2481_p11 }
 0x955   : > { %2491 = shalt.err (!%p2488_p10)
}
 0x956   : > { %2186 = dma.vmem_to_hbm [thread:$0]  (%p3022_p13), %s2956_s26, 128, %s2954_s2, %s1645_s19  }
 0x957 PF: > { %s1670_s9 = sand.u32 1, %s2530_s15   ;;  %p3023_p4 = scmp.ne.s32.totalorder %s3009_s22, 0 }
 0x958   : > { %p3024_p7 = scmp.ge.s32.totalorder %s2542_s18, 2  ;;  %s1671_s21 = scalar_lea.sflag [#allocation5], %s1670_s9 }
 0x95a   : > { %p2203_p3 = pnand %p3024_p7, %p3023_p4 }
 0x95c   : > { %2525 = dma.done.wait (!%p2203_p3), %s1671_s21, 128  }
 0x95d   : > { %2527 = vsyncadd (!%p2203_p3), %s1671_s21, 4294967168  ;;  %p21_p5 = scmp.ge.s32.totalorder %s2691_s11, 4   ;;  %s3025_s15 = smov %s2534_s16 }
 0x95e   : > { %s3026_s16 = smov %s2538_s17  ;;  %s3027_s17 = smov %s2700_s14 }
 0x95f   : > { %s3028_s18 = smov %s2691_s11  ;;  %23 = sbr.rel (!%p21_p5) target bundleno = 10 (0xa), region = 111 }
 0x966   :  { %1676 = vsyncpa [#allocation4], 1 }
 0x967   :  { %1678 = vsyncpa [#allocation4 + $0x1], 1 }
 0x968   :  { %1679 = vsyncpa [#allocation7], 1 }
 0x969   :  { %1681 = vsyncpa [#allocation7 + $0x1], 1 }
 0x96a   :  { %1682 = vsyncpa [#allocation10], 1 }
 0x96b   :  { %1683 = vsyncpa [#allocation5], 1 }
 0x96c   :  { %1685 = vsyncpa [#allocation5 + $0x1], 1 }

</bundles_post_ra>
